<compile_context>
chip_gen: v6e
topology: v6e:2x2x1
jax: 0.10.0
libtpu: 0.0.40
codegen_flags: <defaults>
</compile_context>

<pallas_src>
import functools
import math

import jax
import jax.numpy as jnp
from jax.experimental import pallas as pl
from jax.experimental.pallas import tpu as pltpu

NEG_SLOPE = 0.01   # torch.nn.LeakyReLU default negative_slope
LANES = 128

# (kind, in_ch, out_ch[, dilation]) in forward order
LAYERS = (
    ("conv", 2, 16, 1), ("conv", 16, 32, 2), ("conv", 32, 64, 4),   # self.network
    ("lin", 64, 32), ("lin", 32, 16), ("lin", 16, 1),               # self.nn
    ("lin", 1, 16), ("lin", 16, 32), ("lin", 32, 64),               # self.nn_decode
    ("conv", 64, 64, 1), ("conv", 64, 32, 2), ("conv", 32, 16, 4),  # decode_network
    ("lin", 16, 8), ("lin", 8, 4), ("lin", 4, 2),                   # self.decoder
)


def _kernel(x_ref, w_ref, b_ref, out_nn_ref, out_dec_ref, *, offs, ks, tb, L, cin):
    M = tb * L
    b_all = b_ref[...]                                    # (16, 128) f32, zero padded

    def dense(h2, li):
        # h2: (M, K) f32, zero-padded beyond the layer's real fan-in.
        w = w_ref[offs[li]:offs[li] + ks[li], :]          # (K, 128) bf16, static slice
        acc = jnp.dot(h2.astype(jnp.bfloat16), w,
                      preferred_element_type=jnp.float32)
        return acc + b_all[li:li + 1, :]                  # (M, 128)

    def lrelu(v):
        return jnp.where(v > 0, v, NEG_SLOPE * v)

    def conv_relu(h3, li, d):
        # h3: (tb, L, 128); dilated kernel-3 'same' conv as one im2col matmul.
        z = jnp.zeros((tb, d, LANES), jnp.float32)
        hp = jnp.concatenate([z, h3, z], axis=1)          # (tb, L + 2d, 128)
        col = jnp.concatenate([hp[:, k * d:k * d + L, :] for k in range(3)],
                              axis=-1)                    # (tb, L, 384) lane-aligned
        out = dense(col.reshape(M, 3 * LANES), li)
        return jnp.maximum(out, 0.0).reshape(tb, L, LANES)

    def conv0_relu(x3, li, d):
        # First conv: the raw input only has `cin` channels -> three skinny dots.
        z = jnp.zeros((tb, d, cin), jnp.float32)
        hp = jnp.concatenate([z, x3, z], axis=1)          # (tb, L + 2d, cin)
        acc = None
        for k in range(3):
            tap = hp[:, k * d:k * d + L, :].reshape(M, cin)
            wk = w_ref[offs[li] + k * LANES: offs[li] + k * LANES + cin, :]
            p = jnp.dot(tap.astype(jnp.bfloat16), wk,
                        preferred_element_type=jnp.float32)
            acc = p if acc is None else acc + p
        out = acc + b_all[li:li + 1, :]
        return jnp.maximum(out, 0.0).reshape(tb, L, LANES)

    x3 = x_ref[...].astype(jnp.float32)                   # (tb, L, cin)

    # --- encoder TCN: conv -> ReLU (dropout = identity in eval) ---
    h = conv0_relu(x3, 0, 1)
    h = conv_relu(h, 1, 2)
    h = conv_relu(h, 2, 4)

    # --- self.nn: 64 -> 32 -> 16 -> 1 ---
    h2 = h.reshape(M, LANES)
    h2 = lrelu(dense(h2, 3))
    h2 = lrelu(dense(h2, 4))
    out_nn_p = dense(h2, 5)                               # col 0 = out_nn

    # --- self.nn_decode: 1 -> 16 -> 32 -> 64 ---
    h2 = lrelu(dense(out_nn_p, 6))
    h2 = lrelu(dense(h2, 7))
    h2 = dense(h2, 8)

    # --- decode_network TCN ---
    h = h2.reshape(tb, L, LANES)
    h = conv_relu(h, 9, 1)
    h = conv_relu(h, 10, 2)
    h = conv_relu(h, 11, 4)

    # --- self.decoder: 16 -> 8 -> 4 -> 2 ---
    h2 = h.reshape(M, LANES)
    h2 = lrelu(dense(h2, 12))
    h2 = lrelu(dense(h2, 13))
    out_dec_p = dense(h2, 14)                             # cols 0:2 = out_decoded

    # Lane-dense writeback: put the (batch*L) axis on lanes.
    out_nn_ref[...] = out_nn_p.T[0:1, :].astype(out_nn_ref.dtype)
    out_dec_ref[...] = out_dec_p.T[0:2, :].astype(out_dec_ref.dtype)


def pack_params(params):
    """Pack the 30 tiny parameter arrays into one bf16 weight slab + one f32 bias slab."""
    ws, bs = params[0::2], params[1::2]
    blocks, offs, ks = [], [], []
    off = 0
    for spec, w in zip(LAYERS, ws):
        cin, cout = spec[1], spec[2]
        if spec[0] == "conv":
            blk = jnp.zeros((3 * LANES, LANES), jnp.float32)
            for k in range(3):
                blk = blk.at[k * LANES:k * LANES + cin, :cout].set(w[k])
            K = 3 * LANES
        else:
            blk = jnp.zeros((LANES, LANES), jnp.float32)
            blk = blk.at[:cin, :cout].set(w)
            K = LANES
        blocks.append(blk)
        offs.append(off)
        ks.append(K)
        off += K
    w_slab = jnp.concatenate(blocks, axis=0).astype(jnp.bfloat16)
    b_slab = jnp.zeros((16, LANES), jnp.float32)
    for i, b in enumerate(bs):
        bv = b.reshape(-1)
        b_slab = b_slab.at[i, :bv.shape[0]].set(bv)
    return w_slab, b_slab, tuple(offs), tuple(ks)


def conv_autoencoder_forward(x, params, tb=8):
    B, L, C = x.shape
    w_slab, b_slab, offs, ks = pack_params(params)

    TB = max(1, min(tb, B))
    if pl.cdiv(B, TB) > 1 and (TB * L) % LANES != 0:
        # Multi-step grid: lane-dense output blocks need TB*L to be a 128-multiple.
        g = LANES // math.gcd(L, LANES)
        TB = ((TB + g - 1) // g) * g
        if TB >= B:
            TB = B                      # single grid step -> full-extent blocks are legal
    Bp = pl.cdiv(B, TB) * TB
    if Bp != B:
        x = jnp.pad(x, ((0, Bp - B), (0, 0), (0, 0)))
    grid = (Bp // TB,)
    M = TB * L

    kern = functools.partial(_kernel, offs=offs, ks=ks, tb=TB, L=L, cin=C)
    out_nn_t, out_dec_t = pl.pallas_call(
        kern,
        grid=grid,
        in_specs=[
            pl.BlockSpec((TB, L, C), lambda b: (b, 0, 0)),
            pl.BlockSpec(w_slab.shape, lambda b: (0, 0)),
            pl.BlockSpec(b_slab.shape, lambda b: (0, 0)),
        ],
        out_specs=(
            pl.BlockSpec((1, M), lambda b: (0, b)),
            pl.BlockSpec((2, M), lambda b: (0, b)),
        ),
        out_shape=(
            jax.ShapeDtypeStruct((1, Bp * L), jnp.float32),
            jax.ShapeDtypeStruct((2, Bp * L), jnp.float32),
        ),
        compiler_params=pltpu.CompilerParams(dimension_semantics=("parallel",)),
    )(x, w_slab, b_slab)

    out_nn = out_nn_t.reshape(Bp, L)[:B, :, None]                   # (B, L, 1)
    out_dec = out_dec_t.reshape(2, Bp, L).transpose(1, 2, 0)[:B]    # (B, L, 2)
    return out_nn, out_dec


def init_params(key):
    # (conv weight (K,Cin,Cout) or linear weight (in,out), bias (1,Cout)) shapes
    shapes = [
        ((3, 2, 16), (1, 16)), ((3, 16, 32), (1, 32)), ((3, 32, 64), (1, 64)),
        ((64, 32), (1, 32)), ((32, 16), (1, 16)), ((16, 1), (1, 1)),
        ((1, 16), (1, 16)), ((16, 32), (1, 32)), ((32, 64), (1, 64)),
        ((3, 64, 64), (1, 64)), ((3, 64, 32), (1, 32)), ((3, 32, 16), (1, 16)),
        ((16, 8), (1, 8)), ((8, 4), (1, 4)), ((4, 2), (1, 2)),
    ]
    params = []
    for i, (ws, bs) in enumerate(shapes):
        kw, kb = jax.random.split(jax.random.fold_in(key, i))
        params.append(jax.random.normal(kw, ws, jnp.float32) * 0.1)
        params.append(jax.random.normal(kb, bs, jnp.float32) * 0.1)
    return params


def ref_forward(x, params):
    # Pure-JAX f32 reference (independent formulation: explicit pad + slice).
    (ew0, eb0, ew1, eb1, ew2, eb2,
     nw0, nb0, nw1, nb1, nw2, nb2,
     dw0, db0, dw1, db1, dw2, db2,
     cw0, cb0, cw1, cb1, cw2, cb2,
     fw0, fb0, fw1, fb1, fw2, fb2) = params

    def conv(h, w, b, d):
        L = h.shape[0]
        hp = jnp.pad(h, ((d, d), (0, 0)))
        acc = jnp.zeros((L, w.shape[2]), jnp.float32) + b
        for k in range(3):
            acc = acc + hp[k * d:k * d + L, :] @ w[k]
        return acc

    def lrelu(v):
        return jnp.where(v > 0, v, NEG_SLOPE * v)

    def single(h):
        h = jnp.maximum(conv(h, ew0, eb0, 1), 0.0)
        h = jnp.maximum(conv(h, ew1, eb1, 2), 0.0)
        h = jnp.maximum(conv(h, ew2, eb2, 4), 0.0)
        h = lrelu(h @ nw0 + nb0)
        h = lrelu(h @ nw1 + nb1)
        out_nn = h @ nw2 + nb2
        h = lrelu(out_nn @ dw0 + db0)
        h = lrelu(h @ dw1 + db1)
        h = h @ dw2 + db2
        h = jnp.maximum(conv(h, cw0, cb0, 1), 0.0)
        h = jnp.maximum(conv(h, cw1, cb1, 2), 0.0)
        h = jnp.maximum(conv(h, cw2, cb2, 4), 0.0)
        h = lrelu(h @ fw0 + fb0)
        h = lrelu(h @ fw1 + fb1)
        out_dec = h @ fw2 + fb2
        return out_nn, out_dec

    return jax.vmap(single)(x)


if __name__ == "__main__":
    key = jax.random.PRNGKey(0)
    kx, kp = jax.random.split(key)

    B, L, C = 2, 16, 2  # batch, sequence length, input_size=2
    x = jax.random.normal(kx, (B, L, C), jnp.float32)
    params = init_params(kp)

    out_nn, out_dec = conv_autoencoder_forward(x, params)
    jax.block_until_ready((out_nn, out_dec))

    ref_nn, ref_dec = ref_forward(x, params)
    assert out_nn.shape == (B, L, 1) and out_dec.shape == (B, L, 2)
    # bf16 matmul operands (f32 accumulation) -> loosened tolerance vs f32 reference
    assert jnp.allclose(out_nn, ref_nn, atol=2e-2), "out_nn mismatch"
    assert jnp.allclose(out_dec, ref_dec, atol=2e-2), "out_decoded mismatch"
    print("KERNEL_OK")
</pallas_src>

<mosaic_0001>
module attributes {stable_mosaic.version = 11 : i64} {
  func.func @_kernel(%arg0: i32, %arg1: memref<2x16x2xf32, #tpu.memory_space<vmem>>, %arg2: memref<3456x128xbf16, #tpu.memory_space<vmem>>, %arg3: memref<16x128xf32, #tpu.memory_space<vmem>>, %arg4: memref<1x32xf32, #tpu.memory_space<vmem>>, %arg5: memref<2x32xf32, #tpu.memory_space<vmem>>) attributes {dimension_semantics = [#tpu.dimension_semantics<parallel>], iteration_bounds = array<i64: 1>, scalar_prefetch = 0 : i64, scratch_operands = 0 : i64, tpu.core_type = #tpu.core_type<tc>, window_params = [{transform_indices = @transform_0, window_bounds = array<i64: 2, 16, 2>}, {pipeline_mode = #tpu.pipeline_mode<synchronous>, transform_indices = @transform_1, window_bounds = array<i64: 3456, 128>}, {pipeline_mode = #tpu.pipeline_mode<synchronous>, transform_indices = @transform_2, window_bounds = array<i64: 16, 128>}, {transform_indices = @transform_3, window_bounds = array<i64: 1, 32>}, {transform_indices = @transform_4, window_bounds = array<i64: 2, 32>}]} {
    %c0 = arith.constant 0 : index
    %c0_0 = arith.constant 0 : index
    %0 = vector.load %arg3[%c0, %c0_0] : memref<16x128xf32, #tpu.memory_space<vmem>>, vector<16x128xf32>
    %c0_1 = arith.constant 0 : index
    %c0_2 = arith.constant 0 : index
    %c0_3 = arith.constant 0 : index
    %1 = vector.load %arg1[%c0_1, %c0_2, %c0_3] : memref<2x16x2xf32, #tpu.memory_space<vmem>>, vector<2x16x2xf32>
    %cst = arith.constant 0.000000e+00 : f32
    %2 = vector.broadcast %cst : f32 to vector<2x1x2xf32>
    %3 = tpu.concatenate %2, %1, %2 in 1 : vector<2x1x2xf32>, vector<2x16x2xf32>, vector<2x1x2xf32> -> vector<2x18x2xf32>
    %4 = vector.extract_strided_slice %3 {offsets = [0, 0, 0], sizes = [2, 16, 2], strides = [1, 1, 1]} : vector<2x18x2xf32> to vector<2x16x2xf32>
    %5 = vector.shape_cast %4 : vector<2x16x2xf32> to vector<32x2xf32>
    %c0_4 = arith.constant 0 : index
    %c0_5 = arith.constant 0 : index
    %6 = vector.load %arg2[%c0_4, %c0_5] : memref<3456x128xbf16, #tpu.memory_space<vmem>>, vector<2x128xbf16>
    %7 = arith.truncf %5 : vector<32x2xf32> to vector<32x2xbf16>
    %cst_6 = arith.constant dense<0.000000e+00> : vector<32x128xf32>
    %8 = tpu.matmul %7, %6, %cst_6 {dimension_numbers = #tpu.dot_dimension_numbers<[1], [0], [0], [1], [0, 0, 1, 1], [], []>} : vector<32x2xbf16>, vector<2x128xbf16>, vector<32x128xf32> -> vector<32x128xf32>
    %9 = vector.extract_strided_slice %3 {offsets = [0, 1, 0], sizes = [2, 16, 2], strides = [1, 1, 1]} : vector<2x18x2xf32> to vector<2x16x2xf32>
    %10 = vector.shape_cast %9 : vector<2x16x2xf32> to vector<32x2xf32>
    %c128 = arith.constant 128 : index
    %c0_7 = arith.constant 0 : index
    %11 = vector.load %arg2[%c128, %c0_7] : memref<3456x128xbf16, #tpu.memory_space<vmem>>, vector<2x128xbf16>
    %12 = arith.truncf %10 : vector<32x2xf32> to vector<32x2xbf16>
    %cst_8 = arith.constant dense<0.000000e+00> : vector<32x128xf32>
    %13 = tpu.matmul %12, %11, %cst_8 {dimension_numbers = #tpu.dot_dimension_numbers<[1], [0], [0], [1], [0, 0, 1, 1], [], []>} : vector<32x2xbf16>, vector<2x128xbf16>, vector<32x128xf32> -> vector<32x128xf32>
    %14 = arith.addf %8, %13 : vector<32x128xf32>
    %15 = vector.extract_strided_slice %3 {offsets = [0, 2, 0], sizes = [2, 16, 2], strides = [1, 1, 1]} : vector<2x18x2xf32> to vector<2x16x2xf32>
    %16 = vector.shape_cast %15 : vector<2x16x2xf32> to vector<32x2xf32>
    %c256 = arith.constant 256 : index
    %c0_9 = arith.constant 0 : index
    %17 = vector.load %arg2[%c256, %c0_9] : memref<3456x128xbf16, #tpu.memory_space<vmem>>, vector<2x128xbf16>
    %18 = arith.truncf %16 : vector<32x2xf32> to vector<32x2xbf16>
    %cst_10 = arith.constant dense<0.000000e+00> : vector<32x128xf32>
    %19 = tpu.matmul %18, %17, %cst_10 {dimension_numbers = #tpu.dot_dimension_numbers<[1], [0], [0], [1], [0, 0, 1, 1], [], []>} : vector<32x2xbf16>, vector<2x128xbf16>, vector<32x128xf32> -> vector<32x128xf32>
    %20 = arith.addf %14, %19 : vector<32x128xf32>
    %21 = vector.extract_strided_slice %0 {offsets = [0, 0], sizes = [1, 128], strides = [1, 1]} : vector<16x128xf32> to vector<1x128xf32>
    %22 = vector.broadcast %21 : vector<1x128xf32> to vector<32x128xf32>
    %23 = arith.addf %20, %22 : vector<32x128xf32>
    %cst_11 = arith.constant 0.000000e+00 : f32
    %24 = vector.broadcast %cst_11 : f32 to vector<32x128xf32>
    %25 = arith.maximumf %23, %24 : vector<32x128xf32>
    %26 = vector.shape_cast %25 : vector<32x128xf32> to vector<2x16x128xf32>
    %cst_12 = arith.constant 0.000000e+00 : f32
    %27 = vector.broadcast %cst_12 : f32 to vector<2x2x128xf32>
    %28 = tpu.concatenate %27, %26, %27 in 1 : vector<2x2x128xf32>, vector<2x16x128xf32>, vector<2x2x128xf32> -> vector<2x20x128xf32>
    %29 = vector.extract_strided_slice %28 {offsets = [0, 0, 0], sizes = [2, 16, 128], strides = [1, 1, 1]} : vector<2x20x128xf32> to vector<2x16x128xf32>
    %30 = vector.extract_strided_slice %28 {offsets = [0, 2, 0], sizes = [2, 16, 128], strides = [1, 1, 1]} : vector<2x20x128xf32> to vector<2x16x128xf32>
    %31 = vector.extract_strided_slice %28 {offsets = [0, 4, 0], sizes = [2, 16, 128], strides = [1, 1, 1]} : vector<2x20x128xf32> to vector<2x16x128xf32>
    %32 = tpu.concatenate %29, %30, %31 in 2 : vector<2x16x128xf32>, vector<2x16x128xf32>, vector<2x16x128xf32> -> vector<2x16x384xf32>
    %33 = vector.shape_cast %32 : vector<2x16x384xf32> to vector<32x384xf32>
    %c384 = arith.constant 384 : index
    %c0_13 = arith.constant 0 : index
    %34 = vector.load %arg2[%c384, %c0_13] : memref<3456x128xbf16, #tpu.memory_space<vmem>>, vector<384x128xbf16>
    %35 = arith.truncf %33 : vector<32x384xf32> to vector<32x384xbf16>
    %cst_14 = arith.constant dense<0.000000e+00> : vector<32x128xf32>
    %36 = tpu.matmul %35, %34, %cst_14 {dimension_numbers = #tpu.dot_dimension_numbers<[1], [0], [0], [1], [0, 0, 1, 1], [], []>} : vector<32x384xbf16>, vector<384x128xbf16>, vector<32x128xf32> -> vector<32x128xf32>
    %37 = vector.extract_strided_slice %0 {offsets = [1, 0], sizes = [1, 128], strides = [1, 1]} : vector<16x128xf32> to vector<1x128xf32>
    %38 = vector.broadcast %37 : vector<1x128xf32> to vector<32x128xf32>
    %39 = arith.addf %36, %38 : vector<32x128xf32>
    %cst_15 = arith.constant 0.000000e+00 : f32
    %40 = vector.broadcast %cst_15 : f32 to vector<32x128xf32>
    %41 = arith.maximumf %39, %40 : vector<32x128xf32>
    %42 = vector.shape_cast %41 : vector<32x128xf32> to vector<2x16x128xf32>
    %cst_16 = arith.constant 0.000000e+00 : f32
    %43 = vector.broadcast %cst_16 : f32 to vector<2x4x128xf32>
    %44 = tpu.concatenate %43, %42, %43 in 1 : vector<2x4x128xf32>, vector<2x16x128xf32>, vector<2x4x128xf32> -> vector<2x24x128xf32>
    %45 = vector.extract_strided_slice %44 {offsets = [0, 0, 0], sizes = [2, 16, 128], strides = [1, 1, 1]} : vector<2x24x128xf32> to vector<2x16x128xf32>
    %46 = vector.extract_strided_slice %44 {offsets = [0, 4, 0], sizes = [2, 16, 128], strides = [1, 1, 1]} : vector<2x24x128xf32> to vector<2x16x128xf32>
    %47 = vector.extract_strided_slice %44 {offsets = [0, 8, 0], sizes = [2, 16, 128], strides = [1, 1, 1]} : vector<2x24x128xf32> to vector<2x16x128xf32>
    %48 = tpu.concatenate %45, %46, %47 in 2 : vector<2x16x128xf32>, vector<2x16x128xf32>, vector<2x16x128xf32> -> vector<2x16x384xf32>
    %49 = vector.shape_cast %48 : vector<2x16x384xf32> to vector<32x384xf32>
    %c768 = arith.constant 768 : index
    %c0_17 = arith.constant 0 : index
    %50 = vector.load %arg2[%c768, %c0_17] : memref<3456x128xbf16, #tpu.memory_space<vmem>>, vector<384x128xbf16>
    %51 = arith.truncf %49 : vector<32x384xf32> to vector<32x384xbf16>
    %cst_18 = arith.constant dense<0.000000e+00> : vector<32x128xf32>
    %52 = tpu.matmul %51, %50, %cst_18 {dimension_numbers = #tpu.dot_dimension_numbers<[1], [0], [0], [1], [0, 0, 1, 1], [], []>} : vector<32x384xbf16>, vector<384x128xbf16>, vector<32x128xf32> -> vector<32x128xf32>
    %53 = vector.extract_strided_slice %0 {offsets = [2, 0], sizes = [1, 128], strides = [1, 1]} : vector<16x128xf32> to vector<1x128xf32>
    %54 = vector.broadcast %53 : vector<1x128xf32> to vector<32x128xf32>
    %55 = arith.addf %52, %54 : vector<32x128xf32>
    %cst_19 = arith.constant 0.000000e+00 : f32
    %56 = vector.broadcast %cst_19 : f32 to vector<32x128xf32>
    %57 = arith.maximumf %55, %56 : vector<32x128xf32>
    %58 = vector.shape_cast %57 : vector<32x128xf32> to vector<2x16x128xf32>
    %59 = vector.shape_cast %58 : vector<2x16x128xf32> to vector<32x128xf32>
    %c1152 = arith.constant 1152 : index
    %c0_20 = arith.constant 0 : index
    %60 = vector.load %arg2[%c1152, %c0_20] : memref<3456x128xbf16, #tpu.memory_space<vmem>>, vector<128x128xbf16>
    %61 = arith.truncf %59 : vector<32x128xf32> to vector<32x128xbf16>
    %cst_21 = arith.constant dense<0.000000e+00> : vector<32x128xf32>
    %62 = tpu.matmul %61, %60, %cst_21 {dimension_numbers = #tpu.dot_dimension_numbers<[1], [0], [0], [1], [0, 0, 1, 1], [], []>} : vector<32x128xbf16>, vector<128x128xbf16>, vector<32x128xf32> -> vector<32x128xf32>
    %63 = vector.extract_strided_slice %0 {offsets = [3, 0], sizes = [1, 128], strides = [1, 1]} : vector<16x128xf32> to vector<1x128xf32>
    %64 = vector.broadcast %63 : vector<1x128xf32> to vector<32x128xf32>
    %65 = arith.addf %62, %64 : vector<32x128xf32>
    %cst_22 = arith.constant 0.000000e+00 : f32
    %66 = vector.broadcast %cst_22 : f32 to vector<32x128xf32>
    %67 = arith.cmpf ogt, %65, %66 : vector<32x128xf32>
    %cst_23 = arith.constant 0.00999999977 : f32
    %68 = vector.broadcast %cst_23 : f32 to vector<32x128xf32>
    %69 = arith.mulf %68, %65 : vector<32x128xf32>
    %70 = arith.select %67, %65, %69 : vector<32x128xi1>, vector<32x128xf32>
    %c1280 = arith.constant 1280 : index
    %c0_24 = arith.constant 0 : index
    %71 = vector.load %arg2[%c1280, %c0_24] : memref<3456x128xbf16, #tpu.memory_space<vmem>>, vector<128x128xbf16>
    %72 = arith.truncf %70 : vector<32x128xf32> to vector<32x128xbf16>
    %cst_25 = arith.constant dense<0.000000e+00> : vector<32x128xf32>
    %73 = tpu.matmul %72, %71, %cst_25 {dimension_numbers = #tpu.dot_dimension_numbers<[1], [0], [0], [1], [0, 0, 1, 1], [], []>} : vector<32x128xbf16>, vector<128x128xbf16>, vector<32x128xf32> -> vector<32x128xf32>
    %74 = vector.extract_strided_slice %0 {offsets = [4, 0], sizes = [1, 128], strides = [1, 1]} : vector<16x128xf32> to vector<1x128xf32>
    %75 = vector.broadcast %74 : vector<1x128xf32> to vector<32x128xf32>
    %76 = arith.addf %73, %75 : vector<32x128xf32>
    %cst_26 = arith.constant 0.000000e+00 : f32
    %77 = vector.broadcast %cst_26 : f32 to vector<32x128xf32>
    %78 = arith.cmpf ogt, %76, %77 : vector<32x128xf32>
    %cst_27 = arith.constant 0.00999999977 : f32
    %79 = vector.broadcast %cst_27 : f32 to vector<32x128xf32>
    %80 = arith.mulf %79, %76 : vector<32x128xf32>
    %81 = arith.select %78, %76, %80 : vector<32x128xi1>, vector<32x128xf32>
    %c1408 = arith.constant 1408 : index
    %c0_28 = arith.constant 0 : index
    %82 = vector.load %arg2[%c1408, %c0_28] : memref<3456x128xbf16, #tpu.memory_space<vmem>>, vector<128x128xbf16>
    %83 = arith.truncf %81 : vector<32x128xf32> to vector<32x128xbf16>
    %cst_29 = arith.constant dense<0.000000e+00> : vector<32x128xf32>
    %84 = tpu.matmul %83, %82, %cst_29 {dimension_numbers = #tpu.dot_dimension_numbers<[1], [0], [0], [1], [0, 0, 1, 1], [], []>} : vector<32x128xbf16>, vector<128x128xbf16>, vector<32x128xf32> -> vector<32x128xf32>
    %85 = vector.extract_strided_slice %0 {offsets = [5, 0], sizes = [1, 128], strides = [1, 1]} : vector<16x128xf32> to vector<1x128xf32>
    %86 = vector.broadcast %85 : vector<1x128xf32> to vector<32x128xf32>
    %87 = arith.addf %84, %86 : vector<32x128xf32>
    %c1536 = arith.constant 1536 : index
    %c0_30 = arith.constant 0 : index
    %88 = vector.load %arg2[%c1536, %c0_30] : memref<3456x128xbf16, #tpu.memory_space<vmem>>, vector<128x128xbf16>
    %89 = arith.truncf %87 : vector<32x128xf32> to vector<32x128xbf16>
    %cst_31 = arith.constant dense<0.000000e+00> : vector<32x128xf32>
    %90 = tpu.matmul %89, %88, %cst_31 {dimension_numbers = #tpu.dot_dimension_numbers<[1], [0], [0], [1], [0, 0, 1, 1], [], []>} : vector<32x128xbf16>, vector<128x128xbf16>, vector<32x128xf32> -> vector<32x128xf32>
    %91 = vector.extract_strided_slice %0 {offsets = [6, 0], sizes = [1, 128], strides = [1, 1]} : vector<16x128xf32> to vector<1x128xf32>
    %92 = vector.broadcast %91 : vector<1x128xf32> to vector<32x128xf32>
    %93 = arith.addf %90, %92 : vector<32x128xf32>
    %cst_32 = arith.constant 0.000000e+00 : f32
    %94 = vector.broadcast %cst_32 : f32 to vector<32x128xf32>
    %95 = arith.cmpf ogt, %93, %94 : vector<32x128xf32>
    %cst_33 = arith.constant 0.00999999977 : f32
    %96 = vector.broadcast %cst_33 : f32 to vector<32x128xf32>
    %97 = arith.mulf %96, %93 : vector<32x128xf32>
    %98 = arith.select %95, %93, %97 : vector<32x128xi1>, vector<32x128xf32>
    %c1664 = arith.constant 1664 : index
    %c0_34 = arith.constant 0 : index
    %99 = vector.load %arg2[%c1664, %c0_34] : memref<3456x128xbf16, #tpu.memory_space<vmem>>, vector<128x128xbf16>
    %100 = arith.truncf %98 : vector<32x128xf32> to vector<32x128xbf16>
    %cst_35 = arith.constant dense<0.000000e+00> : vector<32x128xf32>
    %101 = tpu.matmul %100, %99, %cst_35 {dimension_numbers = #tpu.dot_dimension_numbers<[1], [0], [0], [1], [0, 0, 1, 1], [], []>} : vector<32x128xbf16>, vector<128x128xbf16>, vector<32x128xf32> -> vector<32x128xf32>
    %102 = vector.extract_strided_slice %0 {offsets = [7, 0], sizes = [1, 128], strides = [1, 1]} : vector<16x128xf32> to vector<1x128xf32>
    %103 = vector.broadcast %102 : vector<1x128xf32> to vector<32x128xf32>
    %104 = arith.addf %101, %103 : vector<32x128xf32>
    %cst_36 = arith.constant 0.000000e+00 : f32
    %105 = vector.broadcast %cst_36 : f32 to vector<32x128xf32>
    %106 = arith.cmpf ogt, %104, %105 : vector<32x128xf32>
    %cst_37 = arith.constant 0.00999999977 : f32
    %107 = vector.broadcast %cst_37 : f32 to vector<32x128xf32>
    %108 = arith.mulf %107, %104 : vector<32x128xf32>
    %109 = arith.select %106, %104, %108 : vector<32x128xi1>, vector<32x128xf32>
    %c1792 = arith.constant 1792 : index
    %c0_38 = arith.constant 0 : index
    %110 = vector.load %arg2[%c1792, %c0_38] : memref<3456x128xbf16, #tpu.memory_space<vmem>>, vector<128x128xbf16>
    %111 = arith.truncf %109 : vector<32x128xf32> to vector<32x128xbf16>
    %cst_39 = arith.constant dense<0.000000e+00> : vector<32x128xf32>
    %112 = tpu.matmul %111, %110, %cst_39 {dimension_numbers = #tpu.dot_dimension_numbers<[1], [0], [0], [1], [0, 0, 1, 1], [], []>} : vector<32x128xbf16>, vector<128x128xbf16>, vector<32x128xf32> -> vector<32x128xf32>
    %113 = vector.extract_strided_slice %0 {offsets = [8, 0], sizes = [1, 128], strides = [1, 1]} : vector<16x128xf32> to vector<1x128xf32>
    %114 = vector.broadcast %113 : vector<1x128xf32> to vector<32x128xf32>
    %115 = arith.addf %112, %114 : vector<32x128xf32>
    %116 = vector.shape_cast %115 : vector<32x128xf32> to vector<2x16x128xf32>
    %cst_40 = arith.constant 0.000000e+00 : f32
    %117 = vector.broadcast %cst_40 : f32 to vector<2x1x128xf32>
    %118 = tpu.concatenate %117, %116, %117 in 1 : vector<2x1x128xf32>, vector<2x16x128xf32>, vector<2x1x128xf32> -> vector<2x18x128xf32>
    %119 = vector.extract_strided_slice %118 {offsets = [0, 0, 0], sizes = [2, 16, 128], strides = [1, 1, 1]} : vector<2x18x128xf32> to vector<2x16x128xf32>
    %120 = vector.extract_strided_slice %118 {offsets = [0, 1, 0], sizes = [2, 16, 128], strides = [1, 1, 1]} : vector<2x18x128xf32> to vector<2x16x128xf32>
    %121 = vector.extract_strided_slice %118 {offsets = [0, 2, 0], sizes = [2, 16, 128], strides = [1, 1, 1]} : vector<2x18x128xf32> to vector<2x16x128xf32>
    %122 = tpu.concatenate %119, %120, %121 in 2 : vector<2x16x128xf32>, vector<2x16x128xf32>, vector<2x16x128xf32> -> vector<2x16x384xf32>
    %123 = vector.shape_cast %122 : vector<2x16x384xf32> to vector<32x384xf32>
    %c1920 = arith.constant 1920 : index
    %c0_41 = arith.constant 0 : index
    %124 = vector.load %arg2[%c1920, %c0_41] : memref<3456x128xbf16, #tpu.memory_space<vmem>>, vector<384x128xbf16>
    %125 = arith.truncf %123 : vector<32x384xf32> to vector<32x384xbf16>
    %cst_42 = arith.constant dense<0.000000e+00> : vector<32x128xf32>
    %126 = tpu.matmul %125, %124, %cst_42 {dimension_numbers = #tpu.dot_dimension_numbers<[1], [0], [0], [1], [0, 0, 1, 1], [], []>} : vector<32x384xbf16>, vector<384x128xbf16>, vector<32x128xf32> -> vector<32x128xf32>
    %127 = vector.extract_strided_slice %0 {offsets = [9, 0], sizes = [1, 128], strides = [1, 1]} : vector<16x128xf32> to vector<1x128xf32>
    %128 = vector.broadcast %127 : vector<1x128xf32> to vector<32x128xf32>
    %129 = arith.addf %126, %128 : vector<32x128xf32>
    %cst_43 = arith.constant 0.000000e+00 : f32
    %130 = vector.broadcast %cst_43 : f32 to vector<32x128xf32>
    %131 = arith.maximumf %129, %130 : vector<32x128xf32>
    %132 = vector.shape_cast %131 : vector<32x128xf32> to vector<2x16x128xf32>
    %cst_44 = arith.constant 0.000000e+00 : f32
    %133 = vector.broadcast %cst_44 : f32 to vector<2x2x128xf32>
    %134 = tpu.concatenate %133, %132, %133 in 1 : vector<2x2x128xf32>, vector<2x16x128xf32>, vector<2x2x128xf32> -> vector<2x20x128xf32>
    %135 = vector.extract_strided_slice %134 {offsets = [0, 0, 0], sizes = [2, 16, 128], strides = [1, 1, 1]} : vector<2x20x128xf32> to vector<2x16x128xf32>
    %136 = vector.extract_strided_slice %134 {offsets = [0, 2, 0], sizes = [2, 16, 128], strides = [1, 1, 1]} : vector<2x20x128xf32> to vector<2x16x128xf32>
    %137 = vector.extract_strided_slice %134 {offsets = [0, 4, 0], sizes = [2, 16, 128], strides = [1, 1, 1]} : vector<2x20x128xf32> to vector<2x16x128xf32>
    %138 = tpu.concatenate %135, %136, %137 in 2 : vector<2x16x128xf32>, vector<2x16x128xf32>, vector<2x16x128xf32> -> vector<2x16x384xf32>
    %139 = vector.shape_cast %138 : vector<2x16x384xf32> to vector<32x384xf32>
    %c2304 = arith.constant 2304 : index
    %c0_45 = arith.constant 0 : index
    %140 = vector.load %arg2[%c2304, %c0_45] : memref<3456x128xbf16, #tpu.memory_space<vmem>>, vector<384x128xbf16>
    %141 = arith.truncf %139 : vector<32x384xf32> to vector<32x384xbf16>
    %cst_46 = arith.constant dense<0.000000e+00> : vector<32x128xf32>
    %142 = tpu.matmul %141, %140, %cst_46 {dimension_numbers = #tpu.dot_dimension_numbers<[1], [0], [0], [1], [0, 0, 1, 1], [], []>} : vector<32x384xbf16>, vector<384x128xbf16>, vector<32x128xf32> -> vector<32x128xf32>
    %143 = vector.extract_strided_slice %0 {offsets = [10, 0], sizes = [1, 128], strides = [1, 1]} : vector<16x128xf32> to vector<1x128xf32>
    %144 = vector.broadcast %143 : vector<1x128xf32> to vector<32x128xf32>
    %145 = arith.addf %142, %144 : vector<32x128xf32>
    %cst_47 = arith.constant 0.000000e+00 : f32
    %146 = vector.broadcast %cst_47 : f32 to vector<32x128xf32>
    %147 = arith.maximumf %145, %146 : vector<32x128xf32>
    %148 = vector.shape_cast %147 : vector<32x128xf32> to vector<2x16x128xf32>
    %cst_48 = arith.constant 0.000000e+00 : f32
    %149 = vector.broadcast %cst_48 : f32 to vector<2x4x128xf32>
    %150 = tpu.concatenate %149, %148, %149 in 1 : vector<2x4x128xf32>, vector<2x16x128xf32>, vector<2x4x128xf32> -> vector<2x24x128xf32>
    %151 = vector.extract_strided_slice %150 {offsets = [0, 0, 0], sizes = [2, 16, 128], strides = [1, 1, 1]} : vector<2x24x128xf32> to vector<2x16x128xf32>
    %152 = vector.extract_strided_slice %150 {offsets = [0, 4, 0], sizes = [2, 16, 128], strides = [1, 1, 1]} : vector<2x24x128xf32> to vector<2x16x128xf32>
    %153 = vector.extract_strided_slice %150 {offsets = [0, 8, 0], sizes = [2, 16, 128], strides = [1, 1, 1]} : vector<2x24x128xf32> to vector<2x16x128xf32>
    %154 = tpu.concatenate %151, %152, %153 in 2 : vector<2x16x128xf32>, vector<2x16x128xf32>, vector<2x16x128xf32> -> vector<2x16x384xf32>
    %155 = vector.shape_cast %154 : vector<2x16x384xf32> to vector<32x384xf32>
    %c2688 = arith.constant 2688 : index
    %c0_49 = arith.constant 0 : index
    %156 = vector.load %arg2[%c2688, %c0_49] : memref<3456x128xbf16, #tpu.memory_space<vmem>>, vector<384x128xbf16>
    %157 = arith.truncf %155 : vector<32x384xf32> to vector<32x384xbf16>
    %cst_50 = arith.constant dense<0.000000e+00> : vector<32x128xf32>
    %158 = tpu.matmul %157, %156, %cst_50 {dimension_numbers = #tpu.dot_dimension_numbers<[1], [0], [0], [1], [0, 0, 1, 1], [], []>} : vector<32x384xbf16>, vector<384x128xbf16>, vector<32x128xf32> -> vector<32x128xf32>
    %159 = vector.extract_strided_slice %0 {offsets = [11, 0], sizes = [1, 128], strides = [1, 1]} : vector<16x128xf32> to vector<1x128xf32>
    %160 = vector.broadcast %159 : vector<1x128xf32> to vector<32x128xf32>
    %161 = arith.addf %158, %160 : vector<32x128xf32>
    %cst_51 = arith.constant 0.000000e+00 : f32
    %162 = vector.broadcast %cst_51 : f32 to vector<32x128xf32>
    %163 = arith.maximumf %161, %162 : vector<32x128xf32>
    %164 = vector.shape_cast %163 : vector<32x128xf32> to vector<2x16x128xf32>
    %165 = vector.shape_cast %164 : vector<2x16x128xf32> to vector<32x128xf32>
    %c3072 = arith.constant 3072 : index
    %c0_52 = arith.constant 0 : index
    %166 = vector.load %arg2[%c3072, %c0_52] : memref<3456x128xbf16, #tpu.memory_space<vmem>>, vector<128x128xbf16>
    %167 = arith.truncf %165 : vector<32x128xf32> to vector<32x128xbf16>
    %cst_53 = arith.constant dense<0.000000e+00> : vector<32x128xf32>
    %168 = tpu.matmul %167, %166, %cst_53 {dimension_numbers = #tpu.dot_dimension_numbers<[1], [0], [0], [1], [0, 0, 1, 1], [], []>} : vector<32x128xbf16>, vector<128x128xbf16>, vector<32x128xf32> -> vector<32x128xf32>
    %169 = vector.extract_strided_slice %0 {offsets = [12, 0], sizes = [1, 128], strides = [1, 1]} : vector<16x128xf32> to vector<1x128xf32>
    %170 = vector.broadcast %169 : vector<1x128xf32> to vector<32x128xf32>
    %171 = arith.addf %168, %170 : vector<32x128xf32>
    %cst_54 = arith.constant 0.000000e+00 : f32
    %172 = vector.broadcast %cst_54 : f32 to vector<32x128xf32>
    %173 = arith.cmpf ogt, %171, %172 : vector<32x128xf32>
    %cst_55 = arith.constant 0.00999999977 : f32
    %174 = vector.broadcast %cst_55 : f32 to vector<32x128xf32>
    %175 = arith.mulf %174, %171 : vector<32x128xf32>
    %176 = arith.select %173, %171, %175 : vector<32x128xi1>, vector<32x128xf32>
    %c3200 = arith.constant 3200 : index
    %c0_56 = arith.constant 0 : index
    %177 = vector.load %arg2[%c3200, %c0_56] : memref<3456x128xbf16, #tpu.memory_space<vmem>>, vector<128x128xbf16>
    %178 = arith.truncf %176 : vector<32x128xf32> to vector<32x128xbf16>
    %cst_57 = arith.constant dense<0.000000e+00> : vector<32x128xf32>
    %179 = tpu.matmul %178, %177, %cst_57 {dimension_numbers = #tpu.dot_dimension_numbers<[1], [0], [0], [1], [0, 0, 1, 1], [], []>} : vector<32x128xbf16>, vector<128x128xbf16>, vector<32x128xf32> -> vector<32x128xf32>
    %180 = vector.extract_strided_slice %0 {offsets = [13, 0], sizes = [1, 128], strides = [1, 1]} : vector<16x128xf32> to vector<1x128xf32>
    %181 = vector.broadcast %180 : vector<1x128xf32> to vector<32x128xf32>
    %182 = arith.addf %179, %181 : vector<32x128xf32>
    %cst_58 = arith.constant 0.000000e+00 : f32
    %183 = vector.broadcast %cst_58 : f32 to vector<32x128xf32>
    %184 = arith.cmpf ogt, %182, %183 : vector<32x128xf32>
    %cst_59 = arith.constant 0.00999999977 : f32
    %185 = vector.broadcast %cst_59 : f32 to vector<32x128xf32>
    %186 = arith.mulf %185, %182 : vector<32x128xf32>
    %187 = arith.select %184, %182, %186 : vector<32x128xi1>, vector<32x128xf32>
    %c3328 = arith.constant 3328 : index
    %c0_60 = arith.constant 0 : index
    %188 = vector.load %arg2[%c3328, %c0_60] : memref<3456x128xbf16, #tpu.memory_space<vmem>>, vector<128x128xbf16>
    %189 = arith.truncf %187 : vector<32x128xf32> to vector<32x128xbf16>
    %cst_61 = arith.constant dense<0.000000e+00> : vector<32x128xf32>
    %190 = tpu.matmul %189, %188, %cst_61 {dimension_numbers = #tpu.dot_dimension_numbers<[1], [0], [0], [1], [0, 0, 1, 1], [], []>} : vector<32x128xbf16>, vector<128x128xbf16>, vector<32x128xf32> -> vector<32x128xf32>
    %191 = vector.extract_strided_slice %0 {offsets = [14, 0], sizes = [1, 128], strides = [1, 1]} : vector<16x128xf32> to vector<1x128xf32>
    %192 = vector.broadcast %191 : vector<1x128xf32> to vector<32x128xf32>
    %193 = arith.addf %190, %192 : vector<32x128xf32>
    %194 = tpu.transpose %87, [1, 0] : vector<32x128xf32> -> vector<128x32xf32>
    %195 = vector.extract_strided_slice %194 {offsets = [0, 0], sizes = [1, 32], strides = [1, 1]} : vector<128x32xf32> to vector<1x32xf32>
    %c0_62 = arith.constant 0 : index
    %c0_63 = arith.constant 0 : index
    %196 = vector.load %arg4[%c0_62, %c0_63] : memref<1x32xf32, #tpu.memory_space<vmem>>, vector<1x32xf32>
    tpu.vector_store %arg4[%c0_62, %c0_63], %195 {strides = array<i32>} : memref<1x32xf32, #tpu.memory_space<vmem>>, vector<1x32xf32>,
    %197 = tpu.transpose %193, [1, 0] : vector<32x128xf32> -> vector<128x32xf32>
    %198 = vector.extract_strided_slice %197 {offsets = [0, 0], sizes = [2, 32], strides = [1, 1]} : vector<128x32xf32> to vector<2x32xf32>
    %c0_64 = arith.constant 0 : index
    %c0_65 = arith.constant 0 : index
    %199 = vector.load %arg5[%c0_64, %c0_65] : memref<2x32xf32, #tpu.memory_space<vmem>>, vector<2x32xf32>
    tpu.vector_store %arg5[%c0_64, %c0_65], %198 {strides = array<i32>} : memref<2x32xf32, #tpu.memory_space<vmem>>, vector<2x32xf32>,
    return
  }
  func.func @transform_0(%arg0: i32) -> (i32, i32, i32) {
    %c0_i32 = arith.constant 0 : i32
    %c0_i32_0 = arith.constant 0 : i32
    %c0_i32_1 = arith.constant 0 : i32
    return %arg0, %c0_i32, %c0_i32_0 : i32, i32, i32
  }
  func.func @transform_1(%arg0: i32) -> (i32, i32) {
    %c0_i32 = arith.constant 0 : i32
    %c0_i32_0 = arith.constant 0 : i32
    %c0_i32_1 = arith.constant 0 : i32
    return %c0_i32, %c0_i32_0 : i32, i32
  }
  func.func @transform_2(%arg0: i32) -> (i32, i32) {
    %c0_i32 = arith.constant 0 : i32
    %c0_i32_0 = arith.constant 0 : i32
    %c0_i32_1 = arith.constant 0 : i32
    return %c0_i32, %c0_i32_0 : i32, i32
  }
  func.func @transform_3(%arg0: i32) -> (i32, i32) {
    %c0_i32 = arith.constant 0 : i32
    %c0_i32_0 = arith.constant 0 : i32
    return %c0_i32, %arg0 : i32, i32
  }
  func.func @transform_4(%arg0: i32) -> (i32, i32) {
    %c0_i32 = arith.constant 0 : i32
    %c0_i32_0 = arith.constant 0 : i32
    return %c0_i32, %arg0 : i32, i32
  }
}

</mosaic_0001>

<bundles_post_ra>
// kernel: tpu_custom_call.1
= control target key start
LH: loop header
LB: loop body
LE: loop exit
PB: predicated region body
PF: predicated region fallthrough
CT: control target
= control target key end

     0   :  { %10 = vsyncpa [#allocation3], 0  ;;  %s4656_s0 = inlined_call_operand.vmem [shape: f32[2,16,2], index: 0, kind: input, shape index: {}]   ;;  %s4657_s1 = inlined_call_operand.hbm [shape: bf16[3456,128], index: 1, kind: input, shape index: {}]   ;;  %s4658_s2 = inlined_call_operand.vmem [shape: f32[16,128], index: 2, kind: input, shape index: {}]   ;;  %s4659_s3 = inlined_call_operand.hbm [shape: f32[1,32], index: 3, kind: output, shape index: {0}]   ;;  %s4660_s4 = inlined_call_operand.hbm [shape: f32[2,32], index: 4, kind: output, shape index: {1}]  }
   0x1   :  { %11 = vsyncpa [#allocation4], 0 }
   0x2   :  { %12 = vsyncpa [#allocation7], 0  ;;  %s4393_s15 = smov [#allocation2]  }
   0x3   :  { %s20_s16 = sshll.u32 %s4393_s15, 4  ;;  %s21_s16 = int_to_ptr.vmem [resolvable:$true] %s20_s16 }
   0x4   :  { %s4335_s17 = scalar_lea.vmem %s21_s16, 27648  ;;  %p4340_p1 = scmp.lt.s32.totalorder %s21_s16, %s21_s16 }
   0x5   :  { %p4336_p0 = scmp.ne.s32.totalorder %s21_s16, %s4335_s17  ;;  %p4341_p2 = scmp.lt.s32.totalorder %s4335_s17, %s4335_s17 }
   0x7   :  { %p4342_p3 = por %p4341_p2, %p4340_p1 }
   0x9   :  { %p4343_p4 = pnand %p4342_p3, %p4336_p0 }
   0xb   :  { %4346 = shalt.err (!%p4343_p4)
}
   0xc   :  { %s4394_s18 = smov 64   ;;  %s4395_s19 = smov 4  }
   0xd   :  { %26 = dma.hbm_to_vmem [thread:$0]  %s4657_s1, 27648, %s21_s16, [#allocation3], %s4394_s18, %s4394_s18, %s4395_s19  }
   0xe   :  { %4387 = dma.done.wait [#allocation3], 27648  }
   0xf   :  { %4388 = vsyncadd [#allocation3], 4294939648  ;;  %vm43_vm0 = vcmask 1040384   ;;  %v82_v0 = vld [vmem:[#allocation2 + $0x40] sm:$0x1]  ;;  %v36_v2 = vld [vmem:[%s4656_s0 + $0x8] sm:$0xff] }
  0x10   :  { %v35_v1 = vld [vmem:[%s4656_s0] sm:$0xff]  ;;  %4125 = vmatprep.subr.msk.bf16.mxu0 %vm43_vm0, %v82_v0  ;;  %v93_v3 = vsel %vm43_vm0, %v82_v0, 0  ;;  %v45_v5 = vrot.slane %v36_v2, 7  ;;  %v37_v7 = vld [vmem:[%s4656_s0 + $0x10] sm:$0xff]  ;;  %vm67_vm1 = vcmask 1046528   ;;  %vm85_vm2 = vcmask 15360  }
  0x11   :  { %v44_v4 = vrot.slane %v35_v1, 7  ;;  %v60_v6 = vld [vmem:[#allocation2] sm:$0x1]  ;;  %3828 = vmatpush3.bf16.msra.mxu0 %v93_v3  ;;  %v38_v8 = vld [vmem:[%s4656_s0 + $0x18] sm:$0xff]  ;;  %v47_v9 = vrot.slane %v37_v7, 7  ;;  %vm202_vm3 = vcmask 1045504  }
  0x12   :  { %v58_v12 = vsel %vm43_vm0, %v45_v5, 0.0  ;;  %4126 = vmatprep.subr.msk.bf16.mxu0 %vm43_vm0, %v60_v6  ;;  %v48_v13 = vrot.slane %v38_v8, 7  ;;  %v151_v17 = vsel %vm43_vm0, %v60_v6, 0  ;;  %v217_v21 = vld [vmem:[#allocation2 + $0x80] sm:$0x1]  ;;  %v4135_v46 = vld [vmem:[#allocation2 + $0x138] sm:$0xff]  }
  0x13   :  { %v46_v10 = vsel %vm43_vm0, %v44_v4, %v45_v5  ;;  %v56_v11 = vsel %vm43_vm0, 0.0, %v44_v4  ;;  %v71_v16 = vrot.slane %v58_v12, 1  ;;  %v57_v20 = vsel %vm43_vm0, 0.0, %v47_v9  ;;  %v4136_v47 = vld [vmem:[#allocation2 + $0x178] sm:$0xff]   ;;  %3547 = vmatprep.subr.bf16.mxu1 %v4135_v46  ;;  %v4138_v49 = vld [vmem:[#allocation2 + $0x130] sm:$0xff]   ;;  %v4141_v52 = vld [vmem:[#allocation2 + $0x128] sm:$0xff]  }
  0x14   :  { %v68_v14 = vrot.slane %v56_v11, 1  ;;  %v69_v15 = vrot.slane %v46_v10, 1  ;;  %v203_v18 = vrot.slane %v56_v11, 2  ;;  %v49_v19 = vsel %vm43_vm0, %v47_v9, %v48_v13  ;;  %v4137_v48 = vld [vmem:[#allocation2 + $0xf8] sm:$0xff]   ;;  %v4139_v50 = vld [vmem:[#allocation2 + $0x170] sm:$0xff]   ;;  %v4142_v53 = vld [vmem:[#allocation2 + $0x168] sm:$0xff]  }
  0x15   :  { %v59_v24 = vsel %vm43_vm0, %v48_v13, 0.0  ;;  %v73_v25 = vrot.slane %v57_v20, 1  ;;  %v204_v27 = vrot.slane %v46_v10, 2  ;;  %v74_v28 = vrot.slane %v49_v19, 1  ;;  %3548 = vmatpush3.bf16.msra.mxu1 %v4137_v48  ;;  %v4140_v51 = vld [vmem:[#allocation2 + $0xf0] sm:$0xff]   ;;  %v4143_v54 = vld [vmem:[#allocation2 + $0xe8] sm:$0xff]  }
  0x16   :  { %v70_v22 = vsel %vm67_vm1, %v68_v14, %v69_v15  ;;  %v72_v23 = vsel %vm67_vm1, %v69_v15, %v71_v16  ;;  %v76_v29 = vrot.slane %v59_v24, 1  ;;  %v206_v30 = vrot.slane %v58_v12, 2  ;;  %3549 = vmatprep.subr.bf16.mxu1 %v4138_v49  ;;  %v4144_v55 = vld [vmem:[#allocation2 + $0x120] sm:$0xff]   ;;  %v4147_v58 = vld [vmem:[#allocation2 + $0x118] sm:$0xff]   ;;  %v4150_v61 = vld [vmem:[#allocation2 + $0x110] sm:$0xff]  }
  0x17   :  { %v83_v26 = vpack.c.bf16 %v72_v23, %v70_v22  ;;  %v211_v31 = vrot.slane %v59_v24, 2  ;;  %v75_v32 = vsel %vm67_vm1, %v73_v25, %v74_v28  ;;  %v61_v34 = vpack.c.bf16 %v46_v10, %v56_v11  ;;  %v4145_v56 = vld [vmem:[#allocation2 + $0x160] sm:$0xff]   ;;  %v4148_v59 = vld [vmem:[#allocation2 + $0x158] sm:$0xff]   ;;  %v4151_v62 = vld [vmem:[#allocation2 + $0x150] sm:$0xff]  }
  0x18   :  { %v77_v33 = vsel %vm67_vm1, %v74_v28, %v76_v29  ;;  %v227_v35 = vsel %vm43_vm0, %v217_v21, 0  ;;  %v208_v37 = vrot.slane %v57_v20, 2  ;;  %v209_v38 = vrot.slane %v49_v19, 2  ;;  %v4146_v57 = vld [vmem:[#allocation2 + $0xe0] sm:$0xff]   ;;  %v4149_v60 = vld [vmem:[#allocation2 + $0xd8] sm:$0xff]   ;;  %v4152_v63 = vld [vmem:[#allocation2 + $0xd0] sm:$0xff]  }
  0x19   :  { %3829 = vmatprep.mubr.msk.bf16.mxu0 %vm85_vm2, %v83_v26  ;;  %v84_v36 = vpack.c.bf16 %v77_v33, %v75_v32  ;;  %v205_v39 = vsel %vm202_vm3, %v203_v18, %v204_v27  ;;  %v207_v40 = vsel %vm202_vm3, %v204_v27, %v206_v30  ;;  %v62_v41 = vpack.c.bf16 %v49_v19, %v57_v20  ;;  %v4153_v0 = vld [vmem:[#allocation2 + $0x108] sm:$0xff]   ;;  %v4156_v3 = vld [vmem:[#allocation2 + $0x100] sm:$0xff]   ;;  %v4159_v6 = vld [vmem:[#allocation2 + $0x1f8] sm:$0xff]  }
  0x1a   :  { %v218_v42 = vpack.c.bf16 %v207_v40, %v205_v39  ;;  %v210_v43 = vsel %vm202_vm3, %v208_v37, %v209_v38  ;;  %v212_v44 = vsel %vm202_vm3, %v209_v38, %v211_v31  ;;  %3550 = vmatpush3.bf16.msra.mxu1 %v4140_v51  ;;  %v4154_v1 = vld [vmem:[#allocation2 + $0x148] sm:$0xff]   ;;  %v4157_v4 = vld [vmem:[#allocation2 + $0x140] sm:$0xff]   ;;  %v4465_v7 = vld [vmem:[#allocation2 + $0x238] sm:$0xff]   ;;  %v282_v10 = vlaneseq }
  0x1b   :  { %3830 = vmatmul.mubr.msk.bf16.vlgmr.msra.gmra.mxu0 %vm85_vm2, %v84_v36  ;;  %v219_v45 = vpack.c.bf16 %v212_v44, %v210_v43  ;;  %3551 = vmatprep.subr.bf16.mxu1 %v4141_v52  ;;  %v4155_v2 = vld [vmem:[#allocation2 + $0xc8] sm:$0xff]   ;;  %v4158_v5 = vld [vmem:[#allocation2 + $0xc0] sm:$0xff]   ;;  %vm298_vm4 = vcmask 1041408   ;;  %vm333_vm5 = vcmask 1043456   ;;  %vm4396_vm7 = vmmov 1  }
  0x1c   :  { %3834 = vmatpush3.bf16.msra.mxu0 %v151_v17  ;;  %3835 = vmatprep.mubr.msk.bf16.mxu0 %vm85_vm2, %v61_v34  ;;  %v4468_v13 = vshrl.u32 %v282_v10, 7  ;;  %v4474_v18 = vld [vmem:[%s4658_s2] sm:$0xff]  ;;  %vm3318_vm6 = vmneg %vm298_vm4 }
  0x1d   :  { %4127 = vmatprep.subr.msk.bf16.mxu0 %vm43_vm0, %v217_v21  ;;  %vm4494_vm8 = vmpackc.low %vm4396_vm7, %vm3318_vm6 }
  0x1e   :  { %3552 = vmatpush3.bf16.msra.mxu1 %v4143_v54  ;;  %v284_v16 = vsub.s32 0, %v4468_v13  ;;  %vm4513_vm9 = vmpackc.low %vm333_vm5, %vm4396_vm7 }
  0x1f   :  { %3553 = vmatprep.subr.bf16.mxu1 %v4144_v55  ;;  %vm3350_vm10 = vmneg %vm333_vm5 }
  0x20   :  { %v285_v21 = vrot.slane %v4474_v18, %v284_v16  ;;  %vm4523_vm11 = vmpackc.low %vm4396_vm7, %vm3350_vm10 }
  0x22   :  { %3554 = vmatpush3.bf16.msra.mxu1 %v4146_v57 }
  0x23   :  { %3836 = vmatmul.mubr.msk.bf16.vlgmr.msra.gmra.mxu0 %vm85_vm2, %v62_v41  ;;  %3555 = vmatprep.subr.bf16.mxu1 %v4147_v58 }
  0x24   :  { %3840 = vmatpush3.bf16.msra.mxu0 %v227_v35  ;;  %3841 = vmatprep.mubr.msk.bf16.mxu0 %vm85_vm2, %v218_v42 }
  0x25   :  { %3845 = vmatprep.subr.bf16.mxu0 %v4136_v47 }
  0x26   :  { %3556 = vmatpush3.bf16.msra.mxu1 %v4149_v60 }
  0x27   :  { %3557 = vmatprep.subr.bf16.mxu1 %v4150_v61 }
  0x2a   :  { %3558 = vmatpush3.bf16.msra.mxu1 %v4152_v63 }
  0x2b   :  { %3842 = vmatmul.mubr.msk.bf16.vlgmr.msra.gmra.mxu0 %vm85_vm2, %v219_v45  ;;  %3559 = vmatprep.subr.bf16.mxu1 %v4153_v0 }
  0x2c   :  { %3846 = vmatpush3.bf16.msra.mxu0 %v4136_v47 }
  0x2d   :  { %3847 = vmatprep.subr.bf16.mxu0 %v4139_v50 }
  0x2e   :  { %3560 = vmatpush3.bf16.msra.mxu1 %v4155_v2 }
  0x2f   :  { %3561 = vmatprep.subr.bf16.mxu1 %v4156_v3 }
  0x30   :  { %3848 = vmatpush3.bf16.msra.mxu0 %v4139_v50 }
  0x31   :  { %3849 = vmatprep.subr.bf16.mxu0 %v4142_v53 }
  0x32   :  { %3562 = vmatpush3.bf16.msra.mxu1 %v4158_v5 }
  0x33   :  { %3585 = vmatprep.subr.bf16.mxu1 %v4159_v6 }
  0x34   :  { %3850 = vmatpush3.bf16.msra.mxu0 %v4142_v53 }
  0x35   :  { %3851 = vmatprep.subr.bf16.mxu0 %v4145_v56 }
  0x38   :  { %3852 = vmatpush3.bf16.msra.mxu0 %v4145_v56 }
  0x39   :  { %3853 = vmatprep.subr.bf16.mxu0 %v4148_v59 }
  0x3c   :  { %3854 = vmatpush3.bf16.msra.mxu0 %v4148_v59 }
  0x3d   :  { %3855 = vmatprep.subr.bf16.mxu0 %v4151_v62 }
  0x40   :  { %3856 = vmatpush3.bf16.msra.mxu0 %v4151_v62 }
  0x41   :  { %3857 = vmatprep.subr.bf16.mxu0 %v4154_v1 }
  0x44   :  { %3858 = vmatpush3.bf16.msra.mxu0 %v4154_v1 }
  0x45   :  { %3859 = vmatprep.subr.bf16.mxu0 %v4157_v4 }
  0x48   :  { %3860 = vmatpush3.bf16.msra.mxu0 %v4157_v4 }
  0x49   :  { %3865 = vmatprep.subr.bf16.mxu0 %v4465_v7 }
  0xdb   :  { %v3831_v8 = vpop.f32.mrf.mxu0 }
  0xdd   :  { %v129_v9 = vpop.f32.mrf.mxu0 }
  0xdf   :  { %v3832_v11 = vpop.f32.mrf.mxu0 }
  0xe1   :  { %v132_v12 = vpop.f32.mrf.mxu0 }
  0xe3   :  { %v3837_v14 = vpop.f32.mrf.mxu0 }
  0xe4   :  { %v196_v20 = vadd.f32 %v3837_v14, %v3831_v8 }
  0xe5   :  { %v187_v15 = vpop.f32.mrf.mxu0 }
  0xe6   :  { %v188_v23 = vadd.f32 %v187_v15, %v129_v9  ;;  %v4161_v15 = vld [vmem:[#allocation2 + $0x1f0] sm:$0xff]   ;;  %v4291_v9 = vld [vmem:[#allocation2 + $0x598] sm:$0xff]  }
  0xe7   :  { %v3838_v17 = vpop.f32.mrf.mxu0 }
  0xe8   :  { %v199_v26 = vadd.f32 %v3838_v17, %v3832_v11  ;;  %v4160_v11 = vld [vmem:[#allocation2 + $0x1b8] sm:$0xff]  }
  0xe9   :  { %v190_v19 = vpop.f32.mrf.mxu0 }
  0xea   :  { %v191_v30 = vadd.f32 %v190_v19, %v132_v12  ;;  %v4163_v19 = vld [vmem:[#allocation2 + $0x1b0] sm:$0xff]  }
  0xeb   :  { %v3843_v22 = vpop.f32.mrf.mxu0 }
  0xec   :  { %v280_v24 = vadd.f32 %v3843_v22, %v196_v20  ;;  %v4165_v22 = vld [vmem:[#allocation2 + $0x230] sm:$0xff]  }
  0xed   :  { %v263_v25 = vpop.f32.mrf.mxu0 }
  0xee   :  { %v288_v27 = vadd.f32 %v285_v21, %v280_v24  ;;  %v278_v28 = vadd.f32 %v263_v25, %v188_v23  ;;  %v4166_v23 = vld [vmem:[#allocation2 + $0x1a8] sm:$0xff]   ;;  %v4167_v24 = vld [vmem:[#allocation2 + $0x1e0] sm:$0xff]  }
  0xef   :  { %v3844_v29 = vpop.f32.mrf.mxu0  ;;  %v4168_v25 = vld [vmem:[#allocation2 + $0x228] sm:$0xff]  }
  0xf0   :  { %v292_v31 = vmax.f32 %v288_v27, 0.0  ;;  %v286_v32 = vadd.f32 %v285_v21, %v278_v28  ;;  %v281_v33 = vadd.f32 %v3844_v29, %v199_v26  ;;  %v4169_v26 = vld [vmem:[#allocation2 + $0x1a0] sm:$0xff]   ;;  %v4172_v28 = vld [vmem:[#allocation2 + $0x198] sm:$0xff]   ;;  %v4173_v29 = vld [vmem:[#allocation2 + $0x1d0] sm:$0xff]  }
  0xf1   :  { %v266_v34 = vpop.f32.mrf.mxu0  ;;  %v4171_v27 = vld [vmem:[#allocation2 + $0x220] sm:$0xff]  }
  0xf2   :  { %v302_v35 = vrot.slane %v292_v31, 6  ;;  %v290_v36 = vmax.f32 %v286_v32, 0.0  ;;  %v289_v37 = vadd.f32 %v285_v21, %v281_v33  ;;  %v279_v38 = vadd.f32 %v266_v34, %v191_v30  ;;  %v4174_v30 = vld [vmem:[#allocation2 + $0x218] sm:$0xff]   ;;  %v4175_v31 = vld [vmem:[#allocation2 + $0x190] sm:$0xff]   ;;  %v4176_v32 = vld [vmem:[#allocation2 + $0x1c8] sm:$0xff]  }
  0xf3   :  { %v4177_v33 = vld [vmem:[#allocation2 + $0x210] sm:$0xff]   ;;  %v4178_v34 = vld [vmem:[#allocation2 + $0x188] sm:$0xff]  }
  0xf4   :  { %v312_v39 = vsel %vm298_vm4, 0.0, %v302_v35  ;;  %v299_v40 = vrot.slane %v290_v36, 6  ;;  %v293_v41 = vmax.f32 %v289_v37, 0.0  ;;  %v287_v42 = vadd.f32 %v285_v21, %v279_v38  ;;  %v4164_v21 = vld [vmem:[#allocation2 + $0x1e8] sm:$0xff]   ;;  %v4181_v37 = vld [vmem:[#allocation2 + $0x180] sm:$0xff]  }
  0xf5   :  { %v324_v46 = vrot.slane %v312_v39, 2  ;;  %v339_v47 = vrot.slane %v312_v39, 4  ;;  %v4180_v36 = vld [vmem:[#allocation2 + $0x208] sm:$0xff]   ;;  %v4182_v38 = vld [vmem:[#allocation2 + $0x200] sm:$0xff]   ;;  %v4183_v39 = vld [vmem:[#allocation2 + $0x278] sm:$0xff]  }
  0xf6   :  { %v303_v43 = vrot.slane %v293_v41, 6  ;;  %v291_v44 = vmax.f32 %v287_v42, 0.0  ;;  %v311_v45 = vsel %vm298_vm4, 0.0, %v299_v40 }
  0xf7   :  { %v319_v53 = vrot.slane %v311_v45, 2  ;;  %v334_v58 = vrot.slane %v311_v45, 4 }
  0xf8   :  { %v304_v48 = vsel %vm298_vm4, %v302_v35, %v303_v43  ;;  %v314_v49 = vsel %vm298_vm4, %v303_v43, 0.0  ;;  %v300_v50 = vrot.slane %v291_v44, 6 }
  0xf9   :  { %v340_v51 = vrot.slane %v304_v48, 4  ;;  %v342_v52 = vrot.slane %v314_v49, 4  ;;  %v325_v54 = vrot.slane %v304_v48, 2  ;;  %v327_v55 = vrot.slane %v314_v49, 2 }
  0xfa   :  { %v313_v56 = vsel %vm298_vm4, %v300_v50, 0.0  ;;  %v301_v57 = vsel %vm298_vm4, %v299_v40, %v300_v50  ;;  %v3324_v20 = vpack.c.bf16 %v304_v48, %v302_v35  ;;  %v4179_v35 = vld [vmem:[#allocation2 + $0x1c0] sm:$0xff]  }
  0xfb   :  { %v337_v59 = vrot.slane %v313_v56, 4  ;;  %v320_v60 = vrot.slane %v301_v57, 2  ;;  %v322_v61 = vrot.slane %v313_v56, 2  ;;  %v335_v62 = vrot.slane %v301_v57, 4 }
  0xfc   :  { %v341_v63 = vsel %vm333_vm5, %v339_v47, %v340_v51  ;;  %v343_v0 = vsel %vm333_vm5, %v340_v51, %v342_v52  ;;  %v326_v1 = vsel %vm202_vm3, %v324_v46, %v325_v54  ;;  %v328_v10 = vsel %vm202_vm3, %v325_v54, %v327_v55 }
  0xfd   :  { %v321_v2 = vsel %vm202_vm3, %v319_v53, %v320_v60  ;;  %v323_v3 = vsel %vm202_vm3, %v320_v60, %v322_v61  ;;  %v336_v4 = vsel %vm333_vm5, %v334_v58, %v335_v62  ;;  %v338_v5 = vsel %vm333_vm5, %v335_v62, %v337_v59 }
  0xfe   :  { %v397_v6 = vpack.c.bf16 %v323_v3, %v321_v2  ;;  %v398_v8 = vpack.c.bf16 %v338_v5, %v336_v4  ;;  %v3320_v12 = vpack.c.bf16 %v301_v57, %v299_v40  ;;  %v401_v14 = vpack.c.bf16 %v343_v0, %v341_v63 }
  0xff   :  { %v400_v17 = vpack.c.bf16 %v328_v10, %v326_v1  ;;  %v404_v40 = vsub.s32 1, %v4468_v13 }
 0x100   :  { %582 = vmatprep.mubr.bf16.mxu1 %v397_v6  ;;  %3861 = vmatprep.mubr.bf16.mxu0 %v398_v8 }
 0x101   :  { %3321 = vmatmul.mubr.msk.bf16.vlgmr.msra.gmra.mxu1 %vm4494_vm8, %v3320_v12  ;;  %3862 = vmatmul.mubr.bf16.vlgmr.msra.gmra.mxu0 %v401_v14  ;;  %v405_v43 = vrot.slane %v4474_v18, %v404_v40 }
 0x102   :  { %590 = vmatprep.mubr.bf16.mxu1 %v400_v17  ;;  %3586 = vmatpush3.bf16.msra.mxu1 %v4160_v11  ;;  %v4307_v11 = vld [vmem:[#allocation2 + $0x618] sm:$0xff]  }
 0x103   :  { %3587 = vmatprep.subr.bf16.mxu1 %v4161_v15  ;;  %3866 = vmatpush3.bf16.msra.mxu0 %v4465_v7  ;;  %v4170_v7 = vld [vmem:[#allocation2 + $0x1d8] sm:$0xff]  }
 0x104   :  { %3867 = vmatprep.subr.bf16.mxu0 %v4165_v22 }
 0x106   :  { %3588 = vmatpush3.bf16.msra.mxu1 %v4163_v19 }
 0x107   :  { %3589 = vmatprep.subr.bf16.mxu1 %v4164_v21  ;;  %3868 = vmatpush3.bf16.msra.mxu0 %v4165_v22 }
 0x108   :  { %3869 = vmatprep.subr.bf16.mxu0 %v4168_v25 }
 0x109   :  { %3325 = vmatmul.mubr.msk.bf16.gmra.mxu1 %vm4494_vm8, %v3324_v20 }
 0x10a   :  { %3590 = vmatpush3.bf16.msra.mxu1 %v4166_v23 }
 0x10b   :  { %3591 = vmatprep.subr.bf16.mxu1 %v4167_v24  ;;  %3870 = vmatpush3.bf16.msra.mxu0 %v4168_v25  ;;  %v4311_v25 = vld [vmem:[#allocation2 + $0x678] sm:$0xff]  }
 0x10c   :  { %3871 = vmatprep.subr.bf16.mxu0 %v4171_v27 }
 0x10e   :  { %3592 = vmatpush3.bf16.msra.mxu1 %v4169_v26 }
 0x10f   :  { %3593 = vmatprep.subr.bf16.mxu1 %v4170_v7  ;;  %3872 = vmatpush3.bf16.msra.mxu0 %v4171_v27  ;;  %v4184_v7 = vld [vmem:[#allocation2 + $0x270] sm:$0xff]  }
 0x110   :  { %3873 = vmatprep.subr.bf16.mxu0 %v4174_v30 }
 0x112   :  { %3594 = vmatpush3.bf16.msra.mxu1 %v4172_v28 }
 0x113   :  { %3595 = vmatprep.subr.bf16.mxu1 %v4173_v29  ;;  %3874 = vmatpush3.bf16.msra.mxu0 %v4174_v30 }
 0x114   :  { %3875 = vmatprep.subr.bf16.mxu0 %v4177_v33 }
 0x116   :  { %3596 = vmatpush3.bf16.msra.mxu1 %v4175_v31 }
 0x117   :  { %3597 = vmatprep.subr.bf16.mxu1 %v4176_v32  ;;  %3876 = vmatpush3.bf16.msra.mxu0 %v4177_v33 }
 0x118   :  { %3877 = vmatprep.subr.bf16.mxu0 %v4180_v36 }
 0x11a   :  { %3598 = vmatpush3.bf16.msra.mxu1 %v4178_v34 }
 0x11b   :  { %3599 = vmatprep.subr.bf16.mxu1 %v4179_v35  ;;  %3878 = vmatpush3.bf16.msra.mxu0 %v4180_v36 }
 0x11c   :  { %3879 = vmatprep.subr.bf16.mxu0 %v4182_v38 }
 0x11e   :  { %3600 = vmatpush3.bf16.msra.mxu1 %v4181_v37 }
 0x11f   :  { %3880 = vmatpush3.bf16.msra.mxu0 %v4182_v38  ;;  %3885 = vmatprep.subr.bf16.mxu1 %v4183_v39 }
 0x1c1   :  { %v3563_v41 = vpop.f32.mrf.mxu1  ;;  %v3863_v42 = vpop.f32.mrf.mxu0 }
 0x1c3   :  { %v3564_v44 = vpop.f32.mrf.mxu1  ;;  %v633_v45 = vpop.f32.mrf.mxu0 }
 0x1c4   :  { %v3565_v46 = vadd.f32 %v3564_v44, %v3563_v41  ;;  %v4186_v41 = vld [vmem:[#allocation2 + $0x260] sm:$0xff]   ;;  %v4189_v44 = vld [vmem:[#allocation2 + $0x248] sm:$0xff]  }
 0x1c5   :  { %v3566_v47 = vpop.f32.mrf.mxu1  ;;  %v3864_v49 = vpop.f32.mrf.mxu0 }
 0x1c6   :  { %v585_v48 = vadd.f32 %v3565_v46, %v405_v43  ;;  %v4191_v46 = vld [vmem:[#allocation2 + $0x2b8] sm:$0xff]  }
 0x1c7   :  { %v3567_v50 = vpop.f32.mrf.mxu1  ;;  %v636_v56 = vpop.f32.mrf.mxu0  ;;  %3905 = vmatprep.subr.bf16.mxu0 %v4191_v46 }
 0x1c8   :  { %v634_v51 = vadd.f32 %v633_v45, %v585_v48  ;;  %v3568_v52 = vadd.f32 %v3567_v50, %v3566_v47  ;;  %v4190_v45 = vld [vmem:[#allocation2 + $0x240] sm:$0xff]   ;;  %v4192_v47 = vld [vmem:[#allocation2 + $0x2b0] sm:$0xff]   ;;  %v4193_v48 = vld [vmem:[#allocation2 + $0x2a8] sm:$0xff]  }
 0x1c9   :  { %v3569_v53 = vpop.f32.mrf.mxu1  ;;  %v4195_v50 = vld [vmem:[#allocation2 + $0x298] sm:$0xff]  }
 0x1ca   :  { %v648_v54 = vmax.f32 %v634_v51, 0.0  ;;  %v588_v55 = vadd.f32 %v3568_v52, %v405_v43  ;;  %v746_v51 = vsub.s32 2, %v4468_v13 }
 0x1cb   :  { %v3570_v57 = vpop.f32.mrf.mxu1 }
 0x1cc   :  { %v656_v58 = vrot.slane %v648_v54, 4  ;;  %v637_v59 = vadd.f32 %v636_v56, %v588_v55  ;;  %v3571_v60 = vadd.f32 %v3570_v57, %v3569_v53  ;;  %v747_v53 = vrot.slane %v4474_v18, %v746_v51 }
 0x1cd   :  { %v3572_v61 = vpop.f32.mrf.mxu1 }
 0x1ce   :  { %v649_v62 = vmax.f32 %v637_v59, 0.0  ;;  %v593_v63 = vadd.f32 %v3571_v60, %v405_v43  ;;  %v668_v1 = vsel %vm333_vm5, 0.0, %v656_v58 }
 0x1cf   :  { %v3573_v0 = vpop.f32.mrf.mxu1  ;;  %v676_v12 = vrot.slane %v668_v1, 4 }
 0x1d0   :  { %v657_v2 = vrot.slane %v649_v62, 4  ;;  %v642_v3 = vadd.f32 %v3863_v42, %v593_v63  ;;  %v3574_v4 = vadd.f32 %v3573_v0, %v3572_v61  ;;  %v4187_v42 = vld [vmem:[#allocation2 + $0x258] sm:$0xff]  }
 0x1d2   :  { %v658_v5 = vsel %vm333_vm5, %v656_v58, %v657_v2  ;;  %v670_v6 = vsel %vm333_vm5, %v657_v2, 0.0  ;;  %v650_v8 = vmax.f32 %v642_v3, 0.0  ;;  %v596_v10 = vadd.f32 %v3574_v4, %v405_v43  ;;  %v4188_v43 = vld [vmem:[#allocation2 + $0x250] sm:$0xff]  }
 0x1d3   :  { %v677_v14 = vrot.slane %v658_v5, 4  ;;  %v679_v15 = vrot.slane %v670_v6, 4  ;;  %v3359_v17 = vpack.c.bf16 %v657_v2, %v658_v5  ;;  %v3352_v26 = vpack.c.bf16 %v658_v5, %v656_v58 }
 0x1d4   :  { %v659_v19 = vrot.slane %v650_v8, 4  ;;  %v645_v20 = vadd.f32 %v3864_v49, %v596_v10  ;;  %v4194_v49 = vld [vmem:[#allocation2 + $0x2a0] sm:$0xff]  }
 0x1d5   :  { %3881 = vmatprep.mubr.msk.bf16.mxu0 %vm4513_vm9, %v3359_v17  ;;  %v678_v21 = vsel %vm333_vm5, %v676_v12, %v677_v14  ;;  %v680_v22 = vsel %vm333_vm5, %v677_v14, %v679_v15 }
 0x1d6   :  { %v651_v23 = vmax.f32 %v645_v20, 0.0  ;;  %v739_v24 = vpack.c.bf16 %v680_v22, %v678_v21  ;;  %v669_v28 = vsel %vm333_vm5, 0.0, %v659_v19 }
 0x1d7   :  { %v681_v32 = vrot.slane %v669_v28, 4  ;;  %v4199_v28 = vld [vmem:[#allocation2 + $0x2f8] sm:$0xff]  }
 0x1d8   :  { %v660_v27 = vrot.slane %v651_v23, 4  ;;  %924 = vmatprep.mubr.bf16.mxu1 %v739_v24 }
 0x1d9   :  { %3353 = vmatmul.mubr.msk.bf16.vlgmr.msra.gmra.mxu1 %vm4523_vm11, %v3352_v26  ;;  %v4196_v26 = vld [vmem:[#allocation2 + $0x290] sm:$0xff]  }
 0x1da   :  { %v661_v29 = vsel %vm333_vm5, %v659_v19, %v660_v27  ;;  %v671_v30 = vsel %vm333_vm5, %v660_v27, 0.0  ;;  %3886 = vmatpush3.bf16.msra.mxu1 %v4183_v39  ;;  %v4185_v39 = vld [vmem:[#allocation2 + $0x268] sm:$0xff]  }
 0x1db   :  { %v3362_v31 = vpack.c.bf16 %v660_v27, %v661_v29  ;;  %v682_v33 = vrot.slane %v661_v29, 4  ;;  %v684_v34 = vrot.slane %v671_v30, 4  ;;  %3887 = vmatprep.subr.bf16.mxu1 %v4184_v7  ;;  %v3356_v38 = vpack.c.bf16 %v661_v29, %v659_v19  ;;  %v4198_v27 = vld [vmem:[#allocation2 + $0x280] sm:$0xff]   ;;  %v4200_v29 = vld [vmem:[#allocation2 + $0x2f0] sm:$0xff]   ;;  %v4201_v30 = vld [vmem:[#allocation2 + $0x2e8] sm:$0xff]  }
 0x1dd   :  { %3882 = vmatmul.mubr.msk.bf16.vlgmr.msra.gmra.mxu0 %vm4513_vm9, %v3362_v31  ;;  %v683_v35 = vsel %vm333_vm5, %v681_v32, %v682_v33  ;;  %v685_v36 = vsel %vm333_vm5, %v682_v33, %v684_v34  ;;  %v4202_v31 = vld [vmem:[#allocation2 + $0x2e0] sm:$0xff]   ;;  %v4203_v32 = vld [vmem:[#allocation2 + $0x2d8] sm:$0xff]   ;;  %v1014_v33 = vsub.s32 3, %v4468_v13 }
 0x1de   :  { %v742_v37 = vpack.c.bf16 %v685_v36, %v683_v35  ;;  %3888 = vmatpush3.bf16.msra.mxu1 %v4184_v7  ;;  %3906 = vmatpush3.bf16.msra.mxu0 %v4191_v46  ;;  %v4197_v7 = vld [vmem:[#allocation2 + $0x288] sm:$0xff]  }
 0x1df   :  { %3889 = vmatprep.subr.bf16.mxu1 %v4185_v39  ;;  %3907 = vmatprep.subr.bf16.mxu0 %v4192_v47  ;;  %v1015_v34 = vrot.slane %v4474_v18, %v1014_v33 }
 0x1e0   :  { %932 = vmatprep.mubr.bf16.mxu1 %v742_v37 }
 0x1e1   :  { %3357 = vmatmul.mubr.msk.bf16.gmra.mxu1 %vm4523_vm11, %v3356_v38 }
 0x1e2   :  { %3890 = vmatpush3.bf16.msra.mxu1 %v4185_v39  ;;  %3908 = vmatpush3.bf16.msra.mxu0 %v4192_v47 }
 0x1e3   :  { %3891 = vmatprep.subr.bf16.mxu1 %v4186_v41  ;;  %3909 = vmatprep.subr.bf16.mxu0 %v4193_v48 }
 0x1e6   :  { %3892 = vmatpush3.bf16.msra.mxu1 %v4186_v41  ;;  %3910 = vmatpush3.bf16.msra.mxu0 %v4193_v48 }
 0x1e7   :  { %3893 = vmatprep.subr.bf16.mxu1 %v4187_v42  ;;  %3911 = vmatprep.subr.bf16.mxu0 %v4194_v49 }
 0x1ea   :  { %3894 = vmatpush3.bf16.msra.mxu1 %v4187_v42  ;;  %3912 = vmatpush3.bf16.msra.mxu0 %v4194_v49 }
 0x1eb   :  { %3895 = vmatprep.subr.bf16.mxu1 %v4188_v43  ;;  %3913 = vmatprep.subr.bf16.mxu0 %v4195_v50 }
 0x1ee   :  { %3896 = vmatpush3.bf16.msra.mxu1 %v4188_v43  ;;  %3914 = vmatpush3.bf16.msra.mxu0 %v4195_v50 }
 0x1ef   :  { %3897 = vmatprep.subr.bf16.mxu1 %v4189_v44  ;;  %3915 = vmatprep.subr.bf16.mxu0 %v4196_v26 }
 0x1f2   :  { %3898 = vmatpush3.bf16.msra.mxu1 %v4189_v44  ;;  %3916 = vmatpush3.bf16.msra.mxu0 %v4196_v26  ;;  %v4212_v26 = vld [vmem:[#allocation2 + $0x310] sm:$0xff]  }
 0x1f3   :  { %3899 = vmatprep.subr.bf16.mxu1 %v4190_v45  ;;  %3917 = vmatprep.subr.bf16.mxu0 %v4197_v7 }
 0x1f6   :  { %3900 = vmatpush3.bf16.msra.mxu1 %v4190_v45  ;;  %3918 = vmatpush3.bf16.msra.mxu0 %v4197_v7  ;;  %v4213_v7 = vld [vmem:[#allocation2 + $0x308] sm:$0xff]  }
 0x1f7   :  { %3919 = vmatprep.subr.bf16.mxu0 %v4198_v27  ;;  %3925 = vmatprep.subr.bf16.mxu1 %v4199_v28 }
 0x1fa   :  { %3920 = vmatpush3.bf16.msra.mxu0 %v4198_v27  ;;  %v4214_v27 = vld [vmem:[#allocation2 + $0x300] sm:$0xff]  }
 0x299   :  { %v3601_v52 = vpop.f32.mrf.mxu1 }
 0x29b   :  { %v3602_v54 = vpop.f32.mrf.mxu1 }
 0x29c   :  { %v3603_v55 = vadd.f32 %v3602_v54, %v3601_v52 }
 0x29d   :  { %v3604_v56 = vpop.f32.mrf.mxu1  ;;  %v3883_v57 = vpop.f32.mrf.mxu0 }
 0x29e   :  { %v927_v58 = vadd.f32 %v3603_v55, %v747_v53  ;;  %v4204_v55 = vld [vmem:[#allocation2 + $0x2d0] sm:$0xff]  }
 0x29f   :  { %v3605_v59 = vpop.f32.mrf.mxu1  ;;  %v975_v60 = vpop.f32.mrf.mxu0 }
 0x2a0   :  { %v3606_v61 = vadd.f32 %v3605_v59, %v3604_v56  ;;  %v976_v0 = vadd.f32 %v975_v60, %v927_v58  ;;  %v4205_v56 = vld [vmem:[#allocation2 + $0x2c8] sm:$0xff]   ;;  %v4207_v58 = vld [vmem:[#allocation2 + $0x338] sm:$0xff]   ;;  %v4208_v59 = vld [vmem:[#allocation2 + $0x330] sm:$0xff]  }
 0x2a1   :  { %v3607_v62 = vpop.f32.mrf.mxu1  ;;  %v3884_v63 = vpop.f32.mrf.mxu0  ;;  %3945 = vmatprep.subr.bf16.mxu0 %v4207_v58  ;;  %v4209_v60 = vld [vmem:[#allocation2 + $0x328] sm:$0xff]  }
 0x2a2   :  { %v930_v1 = vadd.f32 %v3606_v61, %v747_v53  ;;  %v990_v8 = vmax.f32 %v976_v0, 0.0  ;;  %v4210_v61 = vld [vmem:[#allocation2 + $0x320] sm:$0xff]  }
 0x2a3   :  { %v3608_v2 = vpop.f32.mrf.mxu1  ;;  %v978_v3 = vpop.f32.mrf.mxu0 }
 0x2a4   :  { %v3609_v4 = vadd.f32 %v3608_v2, %v3607_v62  ;;  %v979_v5 = vadd.f32 %v978_v3, %v930_v1  ;;  %v4211_v62 = vld [vmem:[#allocation2 + $0x318] sm:$0xff]  }
 0x2a5   :  { %v3610_v6 = vpop.f32.mrf.mxu1 }
 0x2a6   :  { %v935_v10 = vadd.f32 %v3609_v4, %v747_v53  ;;  %v991_v12 = vmax.f32 %v979_v5, 0.0 }
 0x2a7   :  { %v3611_v14 = vpop.f32.mrf.mxu1 }
 0x2a8   :  { %v1010_v15 = vpack.c.bf16 %v991_v12, %v990_v8  ;;  %v3612_v17 = vadd.f32 %v3611_v14, %v3610_v6  ;;  %v984_v19 = vadd.f32 %v3883_v57, %v935_v10  ;;  %v4206_v57 = vld [vmem:[#allocation2 + $0x2c0] sm:$0xff]  }
 0x2aa   :  { %v938_v20 = vadd.f32 %v3612_v17, %v747_v53  ;;  %3901 = vmatprep.mubr.bf16.mxu1 %v1010_v15  ;;  %v992_v22 = vmax.f32 %v984_v19, 0.0 }
 0x2ac   :  { %v987_v21 = vadd.f32 %v3884_v63, %v938_v20  ;;  %v1145_v63 = vsub.s32 4, %v4468_v13 }
 0x2ae   :  { %v993_v23 = vmax.f32 %v987_v21, 0.0  ;;  %v1146_v0 = vrot.slane %v4474_v18, %v1145_v63 }
 0x2b0   :  { %v1011_v24 = vpack.c.bf16 %v993_v23, %v992_v22 }
 0x2b2   :  { %3902 = vmatmul.mubr.bf16.vlgmr.msra.gmra.mxu1 %v1011_v24 }
 0x2b3   :  { %3926 = vmatpush3.bf16.msra.mxu1 %v4199_v28  ;;  %v4215_v28 = vld [vmem:[#allocation2 + $0x378] sm:$0xff]  }
 0x2b4   :  { %3927 = vmatprep.subr.bf16.mxu1 %v4200_v29 }
 0x2b7   :  { %3928 = vmatpush3.bf16.msra.mxu1 %v4200_v29  ;;  %v4216_v29 = vld [vmem:[#allocation2 + $0x370] sm:$0xff]  }
 0x2b8   :  { %3929 = vmatprep.subr.bf16.mxu1 %v4201_v30 }
 0x2bb   :  { %3930 = vmatpush3.bf16.msra.mxu1 %v4201_v30  ;;  %v4217_v30 = vld [vmem:[#allocation2 + $0x368] sm:$0xff]  }
 0x2bc   :  { %3931 = vmatprep.subr.bf16.mxu1 %v4202_v31 }
 0x2bf   :  { %3932 = vmatpush3.bf16.msra.mxu1 %v4202_v31  ;;  %v4218_v31 = vld [vmem:[#allocation2 + $0x360] sm:$0xff]  }
 0x2c0   :  { %3933 = vmatprep.subr.bf16.mxu1 %v4203_v32 }
 0x2c3   :  { %3934 = vmatpush3.bf16.msra.mxu1 %v4203_v32  ;;  %v4219_v32 = vld [vmem:[#allocation2 + $0x358] sm:$0xff]  }
 0x2c4   :  { %3935 = vmatprep.subr.bf16.mxu1 %v4204_v55 }
 0x2c7   :  { %3936 = vmatpush3.bf16.msra.mxu1 %v4204_v55  ;;  %v4227_v55 = vld [vmem:[#allocation2 + $0x398] sm:$0xff]  }
 0x2c8   :  { %3937 = vmatprep.subr.bf16.mxu1 %v4205_v56 }
 0x2cb   :  { %3938 = vmatpush3.bf16.msra.mxu1 %v4205_v56  ;;  %v1395_v56 = vsub.s32 6, %v4468_v13 }
 0x2cc   :  { %3939 = vmatprep.subr.bf16.mxu1 %v4206_v57 }
 0x2cf   :  { %3940 = vmatpush3.bf16.msra.mxu1 %v4206_v57  ;;  %v1396_v57 = vrot.slane %v4474_v18, %v1395_v56 }
 0x2d0   :  { %3965 = vmatprep.subr.bf16.mxu1 %v4215_v28 }
 0x372   :  { %v3903_v35 = vpop.f32.mrf.mxu1 }
 0x373   :  { %v1107_v38 = vadd.f32 %v3903_v35, %v1015_v34 }
 0x374   :  { %v1098_v36 = vpop.f32.mrf.mxu1 }
 0x375   :  { %v1099_v37 = vadd.f32 %v1098_v36, %v1015_v34  ;;  %v1119_v46 = vmul.f32 0.01, %v1107_v38  ;;  %vm1115_vm14 = vcmp.gt.f32.partialorder %v1107_v38, 0.0 }
 0x376   :  { %v3904_v39 = vpop.f32.mrf.mxu1 }
 0x377   :  { %v1110_v41 = vadd.f32 %v3904_v39, %v1015_v34  ;;  %v1117_v43 = vmul.f32 0.01, %v1099_v37  ;;  %vm1113_vm13 = vcmp.gt.f32.partialorder %v1099_v37, 0.0  ;;  %v1123_v52 = vsel %vm1115_vm14, %v1107_v38, %v1119_v46 }
 0x378   :  { %v1101_v42 = vpop.f32.mrf.mxu1 }
 0x379   :  { %vm1116_vm12 = vcmp.gt.f32.partialorder %v1110_v41, 0.0  ;;  %v1120_v44 = vmul.f32 0.01, %v1110_v41  ;;  %v1102_v45 = vadd.f32 %v1101_v42, %v1015_v34  ;;  %v1121_v49 = vsel %vm1113_vm13, %v1099_v37, %v1117_v43 }
 0x37a   :  { %v1276_v34 = vsub.s32 5, %v4468_v13 }
 0x37b   :  { %vm1114_vm15 = vcmp.gt.f32.partialorder %v1102_v45, 0.0  ;;  %v1118_v47 = vmul.f32 0.01, %v1102_v45  ;;  %v1124_v48 = vsel %vm1116_vm12, %v1110_v41, %v1120_v44 }
 0x37c   :  { %v1142_v54 = vpack.c.bf16 %v1124_v48, %v1123_v52  ;;  %v1277_v36 = vrot.slane %v4474_v18, %v1276_v34  ;;  %v4221_v48 = vld [vmem:[#allocation2 + $0x348] sm:$0xff]   ;;  %v4224_v52 = vld [vmem:[#allocation2 + $0x3b0] sm:$0xff]  }
 0x37d   :  { %v1122_v50 = vsel %vm1114_vm15, %v1102_v45, %v1118_v47  ;;  %v4220_v47 = vld [vmem:[#allocation2 + $0x350] sm:$0xff]  }
 0x37e   :  { %v1141_v53 = vpack.c.bf16 %v1122_v50, %v1121_v49  ;;  %v4222_v49 = vld [vmem:[#allocation2 + $0x340] sm:$0xff]   ;;  %v4223_v50 = vld [vmem:[#allocation2 + $0x3b8] sm:$0xff]  }
 0x380   :  { %3921 = vmatprep.mubr.bf16.mxu0 %v1141_v53  ;;  %v4225_v53 = vld [vmem:[#allocation2 + $0x3a8] sm:$0xff]  }
 0x381   :  { %3922 = vmatmul.mubr.bf16.vlgmr.msra.gmra.mxu0 %v1142_v54  ;;  %v4226_v54 = vld [vmem:[#allocation2 + $0x3a0] sm:$0xff]  }
 0x382   :  { %3946 = vmatpush3.bf16.msra.mxu0 %v4207_v58 }
 0x383   :  { %3947 = vmatprep.subr.bf16.mxu0 %v4208_v59 }
 0x386   :  { %3948 = vmatpush3.bf16.msra.mxu0 %v4208_v59 }
 0x387   :  { %3949 = vmatprep.subr.bf16.mxu0 %v4209_v60 }
 0x38a   :  { %3950 = vmatpush3.bf16.msra.mxu0 %v4209_v60 }
 0x38b   :  { %3951 = vmatprep.subr.bf16.mxu0 %v4210_v61 }
 0x38e   :  { %3952 = vmatpush3.bf16.msra.mxu0 %v4210_v61 }
 0x38f   :  { %3953 = vmatprep.subr.bf16.mxu0 %v4211_v62 }
 0x392   :  { %3954 = vmatpush3.bf16.msra.mxu0 %v4211_v62 }
 0x393   :  { %3955 = vmatprep.subr.bf16.mxu0 %v4212_v26 }
 0x396   :  { %3956 = vmatpush3.bf16.msra.mxu0 %v4212_v26  ;;  %v4234_v26 = vld [vmem:[#allocation2 + $0x430] sm:$0xff]  }
 0x397   :  { %3957 = vmatprep.subr.bf16.mxu0 %v4213_v7 }
 0x39a   :  { %3958 = vmatpush3.bf16.msra.mxu0 %v4213_v7  ;;  %v4236_v7 = vld [vmem:[#allocation2 + $0x3f0] sm:$0xff]  }
 0x39b   :  { %3959 = vmatprep.subr.bf16.mxu0 %v4214_v27 }
 0x39e   :  { %3960 = vmatpush3.bf16.msra.mxu0 %v4214_v27  ;;  %v4237_v27 = vld [vmem:[#allocation2 + $0x428] sm:$0xff]  }
 0x39f   :  { %3985 = vmatprep.subr.bf16.mxu0 %v4223_v50 }
 0x441   :  { %v3923_v1 = vpop.f32.mrf.mxu0 }
 0x442   :  { %v1238_v4 = vadd.f32 %v3923_v1, %v1146_v0 }
 0x443   :  { %v1229_v2 = vpop.f32.mrf.mxu0 }
 0x444   :  { %v1230_v3 = vadd.f32 %v1229_v2, %v1146_v0  ;;  %v1250_v15 = vmul.f32 0.01, %v1238_v4  ;;  %vm1246_vm10 = vcmp.gt.f32.partialorder %v1238_v4, 0.0 }
 0x445   :  { %v3924_v5 = vpop.f32.mrf.mxu0 }
 0x446   :  { %v1241_v6 = vadd.f32 %v3924_v5, %v1146_v0  ;;  %v1248_v10 = vmul.f32 0.01, %v1230_v3  ;;  %vm1244_vm6 = vcmp.gt.f32.partialorder %v1230_v3, 0.0  ;;  %v1254_v22 = vsel %vm1246_vm10, %v1238_v4, %v1250_v15 }
 0x447   :  { %v1232_v8 = vpop.f32.mrf.mxu0 }
 0x448   :  { %vm1247_vm2 = vcmp.gt.f32.partialorder %v1241_v6, 0.0  ;;  %v1251_v12 = vmul.f32 0.01, %v1241_v6  ;;  %v1233_v14 = vadd.f32 %v1232_v8, %v1146_v0  ;;  %v1252_v20 = vsel %vm1244_vm6, %v1230_v3, %v1248_v10 }
 0x44a   :  { %vm1245_vm12 = vcmp.gt.f32.partialorder %v1233_v14, 0.0  ;;  %v1249_v17 = vmul.f32 0.01, %v1233_v14  ;;  %v1255_v19 = vsel %vm1247_vm2, %v1241_v6, %v1251_v12 }
 0x44b   :  { %v1273_v24 = vpack.c.bf16 %v1255_v19, %v1254_v22  ;;  %v4228_v19 = vld [vmem:[#allocation2 + $0x390] sm:$0xff]   ;;  %v4231_v22 = vld [vmem:[#allocation2 + $0x438] sm:$0xff]  }
 0x44c   :  { %v1253_v21 = vsel %vm1245_vm12, %v1233_v14, %v1249_v17 }
 0x44d   :  { %v1272_v23 = vpack.c.bf16 %v1253_v21, %v1252_v20  ;;  %v4229_v20 = vld [vmem:[#allocation2 + $0x388] sm:$0xff]   ;;  %v4230_v21 = vld [vmem:[#allocation2 + $0x380] sm:$0xff]  }
 0x44f   :  { %3941 = vmatprep.mubr.bf16.mxu1 %v1272_v23  ;;  %v4232_v23 = vld [vmem:[#allocation2 + $0x478] sm:$0xff]  }
 0x450   :  { %3942 = vmatmul.mubr.bf16.vlgmr.msra.gmra.mxu1 %v1273_v24  ;;  %v4233_v24 = vld [vmem:[#allocation2 + $0x3f8] sm:$0xff]  }
 0x451   :  { %3966 = vmatpush3.bf16.msra.mxu1 %v4215_v28  ;;  %v4239_v28 = vld [vmem:[#allocation2 + $0x3e8] sm:$0xff]  }
 0x452   :  { %3967 = vmatprep.subr.bf16.mxu1 %v4216_v29 }
 0x455   :  { %3968 = vmatpush3.bf16.msra.mxu1 %v4216_v29  ;;  %v4240_v29 = vld [vmem:[#allocation2 + $0x420] sm:$0xff]  }
 0x456   :  { %3969 = vmatprep.subr.bf16.mxu1 %v4217_v30 }
 0x459   :  { %3970 = vmatpush3.bf16.msra.mxu1 %v4217_v30  ;;  %v4242_v30 = vld [vmem:[#allocation2 + $0x3e0] sm:$0xff]  }
 0x45a   :  { %3971 = vmatprep.subr.bf16.mxu1 %v4218_v31 }
 0x45d   :  { %3972 = vmatpush3.bf16.msra.mxu1 %v4218_v31  ;;  %v1526_v31 = vsub.s32 7, %v4468_v13 }
 0x45e   :  { %3973 = vmatprep.subr.bf16.mxu1 %v4219_v32 }
 0x461   :  { %3974 = vmatpush3.bf16.msra.mxu1 %v4219_v32  ;;  %v1527_v32 = vrot.slane %v4474_v18, %v1526_v31 }
 0x462   :  { %3975 = vmatprep.subr.bf16.mxu1 %v4220_v47 }
 0x465   :  { %3976 = vmatpush3.bf16.msra.mxu1 %v4220_v47 }
 0x466   :  { %3977 = vmatprep.subr.bf16.mxu1 %v4221_v48 }
 0x469   :  { %3978 = vmatpush3.bf16.msra.mxu1 %v4221_v48 }
 0x46a   :  { %3979 = vmatprep.subr.bf16.mxu1 %v4222_v49 }
 0x46d   :  { %3980 = vmatpush3.bf16.msra.mxu1 %v4222_v49 }
 0x46e   :  { %3683 = vmatprep.subr.bf16.mxu1 %v4231_v22 }
 0x510   :  { %v3943_v35 = vpop.f32.mrf.mxu1 }
 0x511   :  { %v1369_v44 = vadd.f32 %v3943_v35, %v1277_v36 }
 0x512   :  { %v1360_v37 = vpop.f32.mrf.mxu1 }
 0x513   :  { %v1361_v38 = vadd.f32 %v1360_v37, %v1277_v36 }
 0x514   :  { %v3944_v39 = vpop.f32.mrf.mxu1 }
 0x515   :  { %3191 = vxpose.xlu0.b32.start [1/4] (short) (narrow) %v1361_v38, 8  ;;  %v1372_v41 = vadd.f32 %v3944_v39, %v1277_v36 }
 0x516   :  { %v1363_v42 = vpop.f32.mrf.mxu1 }
 0x517   :  { %v1364_v43 = vadd.f32 %v1363_v42, %v1277_v36  ;;  %v1392_v46 = vpack.c.bf16 %v1372_v41, %v1369_v44 }
 0x519   :  { %v1391_v45 = vpack.c.bf16 %v1364_v43, %v1361_v38  ;;  %3192 = vxpose.xlu0.b32.cont [2/4] (short) (narrow) %v1364_v43, 8 }
 0x51b   :  { %3961 = vmatprep.mubr.bf16.mxu0 %v1391_v45 }
 0x51c   :  { %3962 = vmatmul.mubr.bf16.vlgmr.msra.gmra.mxu0 %v1392_v46 }
 0x51d   :  { %3193 = vxpose.xlu0.b32.cont [3/4] (short) (narrow) %v1369_v44, 8  ;;  %3986 = vmatpush3.bf16.msra.mxu0 %v4223_v50 }
 0x51e   :  { %3987 = vmatprep.subr.bf16.mxu0 %v4224_v52 }
 0x521   :  { %3194 = vxpose.xlu0.b32.end [4/4] (short) (narrow) %v1372_v41, 8  ;;  %3988 = vmatpush3.bf16.msra.mxu0 %v4224_v52 }
 0x522   :  { %3989 = vmatprep.subr.bf16.mxu0 %v4225_v53 }
 0x525   :  { %3990 = vmatpush3.bf16.msra.mxu0 %v4225_v53 }
 0x526   :  { %3991 = vmatprep.subr.bf16.mxu0 %v4226_v54 }
 0x529   :  { %3992 = vmatpush3.bf16.msra.mxu0 %v4226_v54  ;;  %v4235_v54 = vld [vmem:[#allocation2 + $0x470] sm:$0xff]  }
 0x52a   :  { %3993 = vmatprep.subr.bf16.mxu0 %v4227_v55 }
 0x52d   :  { %3994 = vmatpush3.bf16.msra.mxu0 %v4227_v55  ;;  %v4238_v55 = vld [vmem:[#allocation2 + $0x468] sm:$0xff]  }
 0x52e   :  { %3995 = vmatprep.subr.bf16.mxu0 %v4228_v19 }
 0x531   :  { %3996 = vmatpush3.bf16.msra.mxu0 %v4228_v19 }
 0x532   :  { %3997 = vmatprep.subr.bf16.mxu0 %v4229_v20 }
 0x535   :  { %3998 = vmatpush3.bf16.msra.mxu0 %v4229_v20 }
 0x536   :  { %3999 = vmatprep.subr.bf16.mxu0 %v4230_v21 }
 0x539   :  { %4000 = vmatpush3.bf16.msra.mxu0 %v4230_v21 }
 0x53a   :  { %4005 = vmatprep.subr.bf16.mxu0 %v4232_v23 }
 0x5dc   :  { %v3963_v58 = vpop.f32.mrf.mxu0 }
 0x5dd   :  { %v1488_v61 = vadd.f32 %v3963_v58, %v1396_v57  ;;  %v4243_v58 = vld [vmem:[#allocation2 + $0x418] sm:$0xff]  }
 0x5de   :  { %v1479_v59 = vpop.f32.mrf.mxu0 }
 0x5df   :  { %v1480_v60 = vadd.f32 %v1479_v59, %v1396_v57  ;;  %v1500_v5 = vmul.f32 0.01, %v1488_v61  ;;  %vm1496_vm15 = vcmp.gt.f32.partialorder %v1488_v61, 0.0  ;;  %v4244_v59 = vld [vmem:[#allocation2 + $0x458] sm:$0xff]  }
 0x5e0   :  { %v3964_v62 = vpop.f32.mrf.mxu0 }
 0x5e1   :  { %v1491_v0 = vadd.f32 %v3964_v62, %v1396_v57  ;;  %v1498_v2 = vmul.f32 0.01, %v1480_v60  ;;  %vm1494_vm14 = vcmp.gt.f32.partialorder %v1480_v60, 0.0  ;;  %v1504_v14 = vsel %vm1496_vm15, %v1488_v61, %v1500_v5  ;;  %v4246_v61 = vld [vmem:[#allocation2 + $0x410] sm:$0xff]   ;;  %v4253_v5 = vld [vmem:[#allocation2 + $0x440] sm:$0xff]  }
 0x5e2   :  { %v1482_v1 = vpop.f32.mrf.mxu0  ;;  %v4247_v62 = vld [vmem:[#allocation2 + $0x450] sm:$0xff]  }
 0x5e3   :  { %vm1497_vm13 = vcmp.gt.f32.partialorder %v1491_v0, 0.0  ;;  %v1501_v3 = vmul.f32 0.01, %v1491_v0  ;;  %v1483_v4 = vadd.f32 %v1482_v1, %v1396_v57  ;;  %v1502_v10 = vsel %vm1494_vm14, %v1480_v60, %v1498_v2  ;;  %v4241_v57 = vld [vmem:[#allocation2 + $0x460] sm:$0xff]   ;;  %v4245_v60 = vld [vmem:[#allocation2 + $0x3d8] sm:$0xff]   ;;  %v4249_v1 = vld [vmem:[#allocation2 + $0x408] sm:$0xff]  }
 0x5e4   :  { %v4250_v2 = vld [vmem:[#allocation2 + $0x448] sm:$0xff]   ;;  %vm3436_vm14 = vmneg %vm43_vm0 }
 0x5e5   :  { %vm1495_vm2 = vcmp.gt.f32.partialorder %v1483_v4, 0.0  ;;  %v1499_v6 = vmul.f32 0.01, %v1483_v4  ;;  %v1505_v8 = vsel %vm1497_vm13, %v1491_v0, %v1501_v3  ;;  %v4248_v0 = vld [vmem:[#allocation2 + $0x3d0] sm:$0xff]   ;;  %v4251_v3 = vld [vmem:[#allocation2 + $0x3c8] sm:$0xff]   ;;  %vm4583_vm15 = vmpackc.low %vm4396_vm7, %vm3436_vm14 }
 0x5e6   :  { %v1523_v17 = vpack.c.bf16 %v1505_v8, %v1504_v14  ;;  %v4255_v8 = vld [vmem:[#allocation2 + $0x4f8] sm:$0xff]  }
 0x5e7   :  { %v1503_v12 = vsel %vm1495_vm2, %v1483_v4, %v1499_v6  ;;  %v4252_v4 = vld [vmem:[#allocation2 + $0x400] sm:$0xff]  }
 0x5e8   :  { %v1522_v15 = vpack.c.bf16 %v1503_v12, %v1502_v10  ;;  %v4254_v6 = vld [vmem:[#allocation2 + $0x3c0] sm:$0xff]   ;;  %v4259_v10 = vld [vmem:[#allocation2 + $0x538] sm:$0xff]   ;;  %v4563_v12 = vld [vmem:[%s4658_s2 + $0x8] sm:$0xff]  ;;  %s4397_s2 = smov [#allocation5]  }
 0x5e9   :  { %v1658_v14 = vrot.slane %v4563_v12, %v284_v16  ;;  %s3265_s6 = sshll.u32 %s4397_s2, 4  ;;  %s3266_s6 = int_to_ptr.vmem [resolvable:$true] %s3265_s6 }
 0x5ea   :  { %3981 = vmatprep.mubr.bf16.mxu1 %v1522_v15  ;;  %s4347_s7 = scalar_lea.vmem %s3266_s6, 16  ;;  %s4351_s8 = scalar_lea.vmem %s3266_s6, 32 }
 0x5eb   :  { %3982 = vmatmul.mubr.bf16.vlgmr.msra.gmra.mxu1 %v1523_v17  ;;  %p4348_p5 = scmp.ne.s32.totalorder %s3266_s6, %s4347_s7  ;;  %p4352_p6 = scmp.lt.s32.totalorder %s3266_s6, %s3266_s6 }
 0x5ec   :  { %3684 = vmatpush3.bf16.msra.mxu1 %v4233_v24  ;;  %p4353_p7 = scmp.lt.s32.totalorder %s4351_s8, %s4347_s7 }
 0x5ed   :  { %3685 = vmatprep.subr.bf16.mxu1 %v4234_v26 }
 0x5ee   :  { %p4354_p8 = por %p4353_p7, %p4352_p6 }
 0x5f0   :  { %3686 = vmatpush3.bf16.msra.mxu1 %v4236_v7  ;;  %p4355_p9 = pnand %p4354_p8, %p4348_p5 }
 0x5f1   :  { %3687 = vmatprep.subr.bf16.mxu1 %v4237_v27 }
 0x5f4   :  { %3688 = vmatpush3.bf16.msra.mxu1 %v4239_v28 }
 0x5f5   :  { %3689 = vmatprep.subr.bf16.mxu1 %v4240_v29 }
 0x5f8   :  { %3690 = vmatpush3.bf16.msra.mxu1 %v4242_v30 }
 0x5f9   :  { %3691 = vmatprep.subr.bf16.mxu1 %v4243_v58 }
 0x5fc   :  { %3692 = vmatpush3.bf16.msra.mxu1 %v4245_v60 }
 0x5fd   :  { %3693 = vmatprep.subr.bf16.mxu1 %v4246_v61  ;;  %v4256_v61 = vld [vmem:[#allocation2 + $0x4b8] sm:$0xff]  }
 0x600   :  { %3694 = vmatpush3.bf16.msra.mxu1 %v4248_v0 }
 0x601   :  { %3695 = vmatprep.subr.bf16.mxu1 %v4249_v1  ;;  %v4257_v1 = vld [vmem:[#allocation2 + $0x4f0] sm:$0xff]  }
 0x604   :  { %3696 = vmatpush3.bf16.msra.mxu1 %v4251_v3  ;;  %v4258_v3 = vld [vmem:[#allocation2 + $0x4b0] sm:$0xff]  }
 0x605   :  { %3697 = vmatprep.subr.bf16.mxu1 %v4252_v4 }
 0x608   :  { %3698 = vmatpush3.bf16.msra.mxu1 %v4254_v6  ;;  %v4261_v6 = vld [vmem:[#allocation2 + $0x4a8] sm:$0xff]  }
 0x609   :  { %3721 = vmatprep.subr.bf16.mxu1 %v4255_v8  ;;  %v4262_v8 = vld [vmem:[#allocation2 + $0x530] sm:$0xff]  }
 0x6ab   :  { %v3983_v35 = vpop.f32.mrf.mxu1 }
 0x6ac   :  { %v1619_v38 = vadd.f32 %v3983_v35, %v1527_v32 }
 0x6ad   :  { %v1610_v36 = vpop.f32.mrf.mxu1 }
 0x6ae   :  { %v1611_v37 = vadd.f32 %v1610_v36, %v1527_v32  ;;  %v1631_v46 = vmul.f32 0.01, %v1619_v38  ;;  %vm1627_vm12 = vcmp.gt.f32.partialorder %v1619_v38, 0.0 }
 0x6af   :  { %v3984_v39 = vpop.f32.mrf.mxu1 }
 0x6b0   :  { %v1622_v41 = vadd.f32 %v3984_v39, %v1527_v32  ;;  %v1629_v43 = vmul.f32 0.01, %v1611_v37  ;;  %vm1625_vm10 = vcmp.gt.f32.partialorder %v1611_v37, 0.0  ;;  %v1635_v18 = vsel %vm1627_vm12, %v1619_v38, %v1631_v46 }
 0x6b1   :  { %v1613_v42 = vpop.f32.mrf.mxu1 }
 0x6b2   :  { %vm1628_vm6 = vcmp.gt.f32.partialorder %v1622_v41, 0.0  ;;  %v1632_v44 = vmul.f32 0.01, %v1622_v41  ;;  %v1614_v45 = vadd.f32 %v1613_v42, %v1527_v32  ;;  %v1633_v49 = vsel %vm1625_vm10, %v1611_v37, %v1629_v43 }
 0x6b4   :  { %vm1626_vm13 = vcmp.gt.f32.partialorder %v1614_v45, 0.0  ;;  %v1630_v47 = vmul.f32 0.01, %v1614_v45  ;;  %v1636_v48 = vsel %vm1628_vm6, %v1622_v41, %v1632_v44 }
 0x6b5   :  { %v1654_v53 = vpack.c.bf16 %v1636_v48, %v1635_v18 }
 0x6b6   :  { %v1634_v50 = vsel %vm1626_vm13, %v1614_v45, %v1630_v47 }
 0x6b7   :  { %v1653_v52 = vpack.c.bf16 %v1634_v50, %v1633_v49 }
 0x6b9   :  { %4001 = vmatprep.mubr.bf16.mxu0 %v1653_v52 }
 0x6ba   :  { %4002 = vmatmul.mubr.bf16.vlgmr.msra.gmra.mxu0 %v1654_v53 }
 0x6bb   :  { %4006 = vmatpush3.bf16.msra.mxu0 %v4232_v23 }
 0x6bc   :  { %4007 = vmatprep.subr.bf16.mxu0 %v4235_v54 }
 0x6bf   :  { %4008 = vmatpush3.bf16.msra.mxu0 %v4235_v54 }
 0x6c0   :  { %4009 = vmatprep.subr.bf16.mxu0 %v4238_v55 }
 0x6c3   :  { %4010 = vmatpush3.bf16.msra.mxu0 %v4238_v55 }
 0x6c4   :  { %4011 = vmatprep.subr.bf16.mxu0 %v4241_v57 }
 0x6c7   :  { %4012 = vmatpush3.bf16.msra.mxu0 %v4241_v57 }
 0x6c8   :  { %4013 = vmatprep.subr.bf16.mxu0 %v4244_v59 }
 0x6cb   :  { %4014 = vmatpush3.bf16.msra.mxu0 %v4244_v59 }
 0x6cc   :  { %4015 = vmatprep.subr.bf16.mxu0 %v4247_v62 }
 0x6cf   :  { %4016 = vmatpush3.bf16.msra.mxu0 %v4247_v62 }
 0x6d0   :  { %4017 = vmatprep.subr.bf16.mxu0 %v4250_v2 }
 0x6d3   :  { %4018 = vmatpush3.bf16.msra.mxu0 %v4250_v2 }
 0x6d4   :  { %4019 = vmatprep.subr.bf16.mxu0 %v4253_v5 }
 0x6d7   :  { %4020 = vmatpush3.bf16.msra.mxu0 %v4253_v5  ;;  %v4260_v5 = vld [vmem:[#allocation2 + $0x4e8] sm:$0xff]  }
 0x6d8   :  { %4025 = vmatprep.subr.bf16.mxu0 %v4259_v10 }
 0x77a   :  { %v4003_v15 = vpop.f32.mrf.mxu0 }
 0x77b   :  { %v1750_v17 = vadd.f32 %v4003_v15, %v1658_v14  ;;  %v4264_v15 = vld [vmem:[#allocation2 + $0x4a0] sm:$0xff]  }
 0x77c   :  { %v1741_v19 = vpop.f32.mrf.mxu0 }
 0x77d   :  { %v1763_v20 = vrot.slane %v1750_v17, 7  ;;  %v1742_v21 = vadd.f32 %v1741_v19, %v1658_v14  ;;  %v4265_v17 = vld [vmem:[#allocation2 + $0x528] sm:$0xff]   ;;  %v4266_v19 = vld [vmem:[#allocation2 + $0x4d8] sm:$0xff]  }
 0x77e   :  { %v4004_v22 = vpop.f32.mrf.mxu0 }
 0x77f   :  { %v1773_v23 = vsel %vm43_vm0, 0.0, %v1763_v20  ;;  %v1760_v24 = vrot.slane %v1742_v21, 7  ;;  %v1753_v26 = vadd.f32 %v4004_v22, %v1658_v14  ;;  %v4269_v21 = vld [vmem:[#allocation2 + $0x4d0] sm:$0xff]  }
 0x780   :  { %v1744_v7 = vpop.f32.mrf.mxu0  ;;  %v1785_v30 = vrot.slane %v1773_v23, 1  ;;  %v1799_v31 = vrot.slane %v1773_v23, 2  ;;  %v4270_v22 = vld [vmem:[#allocation2 + $0x490] sm:$0xff]   ;;  %v4271_v23 = vld [vmem:[#allocation2 + $0x518] sm:$0xff]  }
 0x781   :  { %v1772_v27 = vsel %vm43_vm0, 0.0, %v1760_v24  ;;  %v1764_v28 = vrot.slane %v1753_v26, 7  ;;  %v1745_v29 = vadd.f32 %v1744_v7, %v1658_v14  ;;  %v4263_v14 = vld [vmem:[#allocation2 + $0x4e0] sm:$0xff]   ;;  %v4273_v26 = vld [vmem:[#allocation2 + $0x488] sm:$0xff]   ;;  %v4274_v7 = vld [vmem:[#allocation2 + $0x510] sm:$0xff]  }
 0x782   :  { %v1780_v36 = vrot.slane %v1772_v27, 1  ;;  %v1794_v41 = vrot.slane %v1772_v27, 2  ;;  %v4275_v27 = vld [vmem:[#allocation2 + $0x4c0] sm:$0xff]  }
 0x783   :  { %v1765_v32 = vsel %vm43_vm0, %v1763_v20, %v1764_v28  ;;  %v1775_v16 = vsel %vm43_vm0, %v1764_v28, 0.0  ;;  %v1761_v35 = vrot.slane %v1745_v29, 7  ;;  %v4276_v28 = vld [vmem:[#allocation2 + $0x480] sm:$0xff]   ;;  %v4277_v29 = vld [vmem:[#allocation2 + $0x508] sm:$0xff]  }
 0x784   :  { %v1786_v37 = vrot.slane %v1765_v32, 1  ;;  %v1800_v38 = vrot.slane %v1765_v32, 2  ;;  %v1802_v39 = vrot.slane %v1775_v16, 2  ;;  %v1788_v42 = vrot.slane %v1775_v16, 1 }
 0x785   :  { %v1762_v43 = vsel %vm43_vm0, %v1760_v24, %v1761_v35  ;;  %v1774_v44 = vsel %vm43_vm0, %v1761_v35, 0.0  ;;  %v3442_v4 = vpack.c.bf16 %v1765_v32, %v1763_v20  ;;  %v4268_v20 = vld [vmem:[#allocation2 + $0x520] sm:$0xff]   ;;  %v4592_v32 = vld [vmem:[#allocation2 + $0x5f8] sm:$0xff]  }
 0x786   :  { %v1781_v45 = vrot.slane %v1762_v43, 1  ;;  %v1783_v46 = vrot.slane %v1774_v44, 1  ;;  %v1795_v47 = vrot.slane %v1762_v43, 2  ;;  %v1797_v48 = vrot.slane %v1774_v44, 2 }
 0x787   :  { %v1801_v49 = vsel %vm202_vm3, %v1799_v31, %v1800_v38  ;;  %v1803_v50 = vsel %vm202_vm3, %v1800_v38, %v1802_v39  ;;  %v1787_v18 = vsel %vm67_vm1, %v1785_v30, %v1786_v37  ;;  %v1789_v60 = vsel %vm67_vm1, %v1786_v37, %v1788_v42  ;;  %v4278_v30 = vld [vmem:[#allocation2 + $0x500] sm:$0xff]   ;;  %v4279_v31 = vld [vmem:[#allocation2 + $0x5b8] sm:$0xff]  }
 0x788   :  { %v1782_v52 = vsel %vm67_vm1, %v1780_v36, %v1781_v45  ;;  %v1784_v53 = vsel %vm67_vm1, %v1781_v45, %v1783_v46  ;;  %v1796_v54 = vsel %vm202_vm3, %v1794_v41, %v1795_v47  ;;  %v1798_v55 = vsel %vm202_vm3, %v1795_v47, %v1797_v48 }
 0x789   :  { %v1857_v57 = vpack.c.bf16 %v1784_v53, %v1782_v52  ;;  %v1858_v58 = vpack.c.bf16 %v1798_v55, %v1796_v54  ;;  %v3438_v62 = vpack.c.bf16 %v1762_v43, %v1760_v24  ;;  %v1861_v0 = vpack.c.bf16 %v1803_v50, %v1801_v49  ;;  %v4272_v24 = vld [vmem:[#allocation2 + $0x4c8] sm:$0xff]  }
 0x78a   :  { %v1860_v2 = vpack.c.bf16 %v1789_v60, %v1787_v18  ;;  %v1865_v36 = vrot.slane %v4563_v12, %v404_v40 }
 0x78b   :  { %2042 = vmatprep.mubr.bf16.mxu1 %v1857_v57  ;;  %4021 = vmatprep.mubr.bf16.mxu0 %v1858_v58 }
 0x78c   :  { %3439 = vmatmul.mubr.msk.bf16.vlgmr.msra.gmra.mxu1 %vm4583_vm15, %v3438_v62  ;;  %4022 = vmatmul.mubr.bf16.vlgmr.msra.gmra.mxu0 %v1861_v0 }
 0x78d   :  { %2050 = vmatprep.mubr.bf16.mxu1 %v1860_v2  ;;  %3722 = vmatpush3.bf16.msra.mxu1 %v4256_v61 }
 0x78e   :  { %3723 = vmatprep.subr.bf16.mxu1 %v4257_v1  ;;  %4026 = vmatpush3.bf16.msra.mxu0 %v4259_v10  ;;  %v4267_v10 = vld [vmem:[#allocation2 + $0x498] sm:$0xff]  }
 0x78f   :  { %4027 = vmatprep.subr.bf16.mxu0 %v4262_v8 }
 0x791   :  { %3724 = vmatpush3.bf16.msra.mxu1 %v4258_v3 }
 0x792   :  { %3725 = vmatprep.subr.bf16.mxu1 %v4260_v5  ;;  %4028 = vmatpush3.bf16.msra.mxu0 %v4262_v8 }
 0x793   :  { %4029 = vmatprep.subr.bf16.mxu0 %v4265_v17 }
 0x794   :  { %3443 = vmatmul.mubr.msk.bf16.gmra.mxu1 %vm4583_vm15, %v3442_v4 }
 0x795   :  { %3726 = vmatpush3.bf16.msra.mxu1 %v4261_v6 }
 0x796   :  { %3727 = vmatprep.subr.bf16.mxu1 %v4263_v14  ;;  %4030 = vmatpush3.bf16.msra.mxu0 %v4265_v17 }
 0x797   :  { %4031 = vmatprep.subr.bf16.mxu0 %v4268_v20 }
 0x799   :  { %3728 = vmatpush3.bf16.msra.mxu1 %v4264_v15 }
 0x79a   :  { %3729 = vmatprep.subr.bf16.mxu1 %v4266_v19  ;;  %4032 = vmatpush3.bf16.msra.mxu0 %v4268_v20 }
 0x79b   :  { %4033 = vmatprep.subr.bf16.mxu0 %v4271_v23 }
 0x79d   :  { %3730 = vmatpush3.bf16.msra.mxu1 %v4267_v10 }
 0x79e   :  { %3731 = vmatprep.subr.bf16.mxu1 %v4269_v21  ;;  %4034 = vmatpush3.bf16.msra.mxu0 %v4271_v23 }
 0x79f   :  { %4035 = vmatprep.subr.bf16.mxu0 %v4274_v7 }
 0x7a1   :  { %3732 = vmatpush3.bf16.msra.mxu1 %v4270_v22 }
 0x7a2   :  { %3733 = vmatprep.subr.bf16.mxu1 %v4272_v24  ;;  %4036 = vmatpush3.bf16.msra.mxu0 %v4274_v7  ;;  %v4280_v7 = vld [vmem:[#allocation2 + $0x578] sm:$0xff]  }
 0x7a3   :  { %4037 = vmatprep.subr.bf16.mxu0 %v4277_v29 }
 0x7a5   :  { %3734 = vmatpush3.bf16.msra.mxu1 %v4273_v26 }
 0x7a6   :  { %3735 = vmatprep.subr.bf16.mxu1 %v4275_v27  ;;  %4038 = vmatpush3.bf16.msra.mxu0 %v4277_v29  ;;  %v4282_v29 = vld [vmem:[#allocation2 + $0x5b0] sm:$0xff]  }
 0x7a7   :  { %4039 = vmatprep.subr.bf16.mxu0 %v4278_v30 }
 0x7a9   :  { %3736 = vmatpush3.bf16.msra.mxu1 %v4276_v28 }
 0x7aa   :  { %4040 = vmatpush3.bf16.msra.mxu0 %v4278_v30  ;;  %3759 = vmatprep.subr.bf16.mxu1 %v4279_v31 }
 0x7ab   :  { %4045 = vmatprep.subr.bf16.mxu0 %v4592_v32 }
 0x84c   :  { %v3699_v16 = vpop.f32.mrf.mxu1  ;;  %v4023_v35 = vpop.f32.mrf.mxu0 }
 0x84e   :  { %v3700_v37 = vpop.f32.mrf.mxu1  ;;  %v2093_v38 = vpop.f32.mrf.mxu0 }
 0x84f   :  { %v3701_v39 = vadd.f32 %v3700_v37, %v3699_v16 }
 0x850   :  { %v3702_v41 = vpop.f32.mrf.mxu1  ;;  %v4024_v43 = vpop.f32.mrf.mxu0 }
 0x851   :  { %v2045_v42 = vadd.f32 %v3701_v39, %v1865_v36 }
 0x852   :  { %v3703_v44 = vpop.f32.mrf.mxu1  ;;  %v2096_v50 = vpop.f32.mrf.mxu0 }
 0x853   :  { %v2094_v45 = vadd.f32 %v2093_v38, %v2045_v42  ;;  %v3704_v46 = vadd.f32 %v3703_v44, %v3702_v41 }
 0x854   :  { %v3705_v47 = vpop.f32.mrf.mxu1 }
 0x855   :  { %v2108_v48 = vmax.f32 %v2094_v45, 0.0  ;;  %v2048_v49 = vadd.f32 %v3704_v46, %v1865_v36 }
 0x856   :  { %v3706_v18 = vpop.f32.mrf.mxu1 }
 0x857   :  { %v2116_v52 = vrot.slane %v2108_v48, 6  ;;  %v2097_v53 = vadd.f32 %v2096_v50, %v2048_v49  ;;  %v3707_v54 = vadd.f32 %v3706_v18, %v3705_v47  ;;  %v4283_v49 = vld [vmem:[#allocation2 + $0x570] sm:$0xff]   ;;  %v4285_v18 = vld [vmem:[#allocation2 + $0x5a8] sm:$0xff]  }
 0x858   :  { %v3708_v55 = vpop.f32.mrf.mxu1  ;;  %v4284_v50 = vld [vmem:[#allocation2 + $0x5f0] sm:$0xff]  }
 0x859   :  { %v2128_v40 = vsel %vm298_vm4, 0.0, %v2116_v52  ;;  %v2109_v57 = vmax.f32 %v2097_v53, 0.0  ;;  %v2053_v58 = vadd.f32 %v3707_v54, %v1865_v36  ;;  %v4287_v53 = vld [vmem:[#allocation2 + $0x5e8] sm:$0xff]   ;;  %v4288_v54 = vld [vmem:[#allocation2 + $0x5a0] sm:$0xff]  }
 0x85a   :  { %v3709_v59 = vpop.f32.mrf.mxu1  ;;  %v2136_v0 = vrot.slane %v2128_v40, 2  ;;  %v2150_v1 = vrot.slane %v2128_v40, 4  ;;  %v4290_v40 = vld [vmem:[#allocation2 + $0x5e0] sm:$0xff]  }
 0x85b   :  { %v2117_v60 = vrot.slane %v2109_v57, 6  ;;  %v2102_v61 = vadd.f32 %v4023_v35, %v2053_v58  ;;  %v3710_v62 = vadd.f32 %v3709_v59, %v3708_v55  ;;  %v4289_v55 = vld [vmem:[#allocation2 + $0x560] sm:$0xff]   ;;  %v4293_v57 = vld [vmem:[#allocation2 + $0x5d8] sm:$0xff]   ;;  %v4294_v58 = vld [vmem:[#allocation2 + $0x590] sm:$0xff]  }
 0x85c   :  { %v4295_v59 = vld [vmem:[#allocation2 + $0x550] sm:$0xff]  }
 0x85d   :  { %v2118_v2 = vsel %vm298_vm4, %v2116_v52, %v2117_v60  ;;  %v2130_v3 = vsel %vm298_vm4, %v2117_v60, 0.0  ;;  %v2110_v4 = vmax.f32 %v2102_v61, 0.0  ;;  %v2056_v5 = vadd.f32 %v3710_v62, %v1865_v36  ;;  %v4296_v60 = vld [vmem:[#allocation2 + $0x5d0] sm:$0xff]   ;;  %v4297_v61 = vld [vmem:[#allocation2 + $0x588] sm:$0xff]  }
 0x85e   :  { %v2137_v6 = vrot.slane %v2118_v2, 2  ;;  %v2139_v8 = vrot.slane %v2130_v3, 2  ;;  %v2151_v14 = vrot.slane %v2118_v2, 4  ;;  %v2153_v15 = vrot.slane %v2130_v3, 4  ;;  %v4298_v62 = vld [vmem:[#allocation2 + $0x548] sm:$0xff]   ;;  %v4302_v3 = vld [vmem:[#allocation2 + $0x5c0] sm:$0xff]  }
 0x85f   :  { %v2119_v17 = vrot.slane %v2110_v4, 6  ;;  %v2105_v19 = vadd.f32 %v4024_v43, %v2056_v5  ;;  %v3470_v27 = vpack.c.bf16 %v2118_v2, %v2116_v52  ;;  %v4286_v52 = vld [vmem:[#allocation2 + $0x568] sm:$0xff]   ;;  %v4301_v2 = vld [vmem:[#allocation2 + $0x540] sm:$0xff]   ;;  %v4303_v4 = vld [vmem:[#allocation2 + $0x638] sm:$0xff]  }
 0x860   :  { %v2138_v10 = vsel %vm202_vm3, %v2136_v0, %v2137_v6  ;;  %v2140_v20 = vsel %vm202_vm3, %v2137_v6, %v2139_v8  ;;  %v2152_v21 = vsel %vm333_vm5, %v2150_v1, %v2151_v14  ;;  %v2154_v22 = vsel %vm333_vm5, %v2151_v14, %v2153_v15  ;;  %v4299_v0 = vld [vmem:[#allocation2 + $0x5c8] sm:$0xff]   ;;  %v4300_v1 = vld [vmem:[#allocation2 + $0x580] sm:$0xff]  }
 0x861   :  { %v2111_v23 = vmax.f32 %v2105_v19, 0.0  ;;  %v2213_v24 = vpack.c.bf16 %v2140_v20, %v2138_v10  ;;  %v2214_v26 = vpack.c.bf16 %v2154_v22, %v2152_v21  ;;  %v2129_v28 = vsel %vm298_vm4, 0.0, %v2119_v17 }
 0x862   :  { %v2155_v31 = vrot.slane %v2129_v28, 4  ;;  %v2141_v36 = vrot.slane %v2129_v28, 2  ;;  %v2221_v15 = vrot.slane %v4563_v12, %v746_v51 }
 0x863   :  { %v2120_v30 = vrot.slane %v2111_v23, 6  ;;  %2398 = vmatprep.mubr.bf16.mxu1 %v2213_v24  ;;  %4041 = vmatprep.mubr.bf16.mxu0 %v2214_v26 }
 0x864   :  { %3471 = vmatmul.mubr.msk.bf16.vlgmr.msra.gmra.mxu1 %vm4494_vm8, %v3470_v27 }
 0x865   :  { %v2121_v16 = vsel %vm298_vm4, %v2119_v17, %v2120_v30  ;;  %v2131_v35 = vsel %vm298_vm4, %v2120_v30, 0.0  ;;  %3760 = vmatpush3.bf16.msra.mxu1 %v4280_v7 }
 0x866   :  { %v2144_v37 = vrot.slane %v2131_v35, 2  ;;  %v2156_v38 = vrot.slane %v2121_v16, 4  ;;  %v2158_v39 = vrot.slane %v2131_v35, 4  ;;  %v2142_v41 = vrot.slane %v2121_v16, 2  ;;  %3761 = vmatprep.subr.bf16.mxu1 %v4282_v29 }
 0x867   :  { %v3474_v48 = vpack.c.bf16 %v2121_v16, %v2119_v17 }
 0x868   :  { %v2143_v42 = vsel %vm202_vm3, %v2141_v36, %v2142_v41  ;;  %v2145_v43 = vsel %vm202_vm3, %v2142_v41, %v2144_v37  ;;  %v2157_v44 = vsel %vm333_vm5, %v2155_v31, %v2156_v38  ;;  %v2159_v45 = vsel %vm333_vm5, %v2156_v38, %v2158_v39 }
 0x869   :  { %v2216_v46 = vpack.c.bf16 %v2145_v43, %v2143_v42  ;;  %v2217_v47 = vpack.c.bf16 %v2159_v45, %v2157_v44  ;;  %3762 = vmatpush3.bf16.msra.mxu1 %v4283_v49 }
 0x86a   :  { %3763 = vmatprep.subr.bf16.mxu1 %v4285_v18 }
 0x86b   :  { %2406 = vmatprep.mubr.bf16.mxu1 %v2216_v46  ;;  %4042 = vmatmul.mubr.bf16.vlgmr.msra.gmra.mxu0 %v2217_v47 }
 0x86c   :  { %3475 = vmatmul.mubr.msk.bf16.gmra.mxu1 %vm4494_vm8, %v3474_v48  ;;  %4046 = vmatpush3.bf16.msra.mxu0 %v4592_v32  ;;  %v4292_v32 = vld [vmem:[#allocation2 + $0x558] sm:$0xff]  }
 0x86d   :  { %4047 = vmatprep.subr.bf16.mxu0 %v4284_v50  ;;  %3764 = vmatpush3.bf16.msra.mxu1 %v4286_v52 }
 0x86e   :  { %3765 = vmatprep.subr.bf16.mxu1 %v4288_v54 }
 0x870   :  { %4048 = vmatpush3.bf16.msra.mxu0 %v4284_v50 }
 0x871   :  { %4049 = vmatprep.subr.bf16.mxu0 %v4287_v53  ;;  %3766 = vmatpush3.bf16.msra.mxu1 %v4289_v55 }
 0x872   :  { %3767 = vmatprep.subr.bf16.mxu1 %v4291_v9 }
 0x874   :  { %4050 = vmatpush3.bf16.msra.mxu0 %v4287_v53 }
 0x875   :  { %4051 = vmatprep.subr.bf16.mxu0 %v4290_v40  ;;  %3768 = vmatpush3.bf16.msra.mxu1 %v4292_v32 }
 0x876   :  { %3769 = vmatprep.subr.bf16.mxu1 %v4294_v58 }
 0x878   :  { %4052 = vmatpush3.bf16.msra.mxu0 %v4290_v40 }
 0x879   :  { %4053 = vmatprep.subr.bf16.mxu0 %v4293_v57  ;;  %3770 = vmatpush3.bf16.msra.mxu1 %v4295_v59 }
 0x87a   :  { %3771 = vmatprep.subr.bf16.mxu1 %v4297_v61 }
 0x87c   :  { %4054 = vmatpush3.bf16.msra.mxu0 %v4293_v57  ;;  %v4304_v57 = vld [vmem:[#allocation2 + $0x630] sm:$0xff]  }
 0x87d   :  { %4055 = vmatprep.subr.bf16.mxu0 %v4296_v60  ;;  %3772 = vmatpush3.bf16.msra.mxu1 %v4298_v62 }
 0x87e   :  { %3773 = vmatprep.subr.bf16.mxu1 %v4300_v1 }
 0x880   :  { %4056 = vmatpush3.bf16.msra.mxu0 %v4296_v60 }
 0x881   :  { %4057 = vmatprep.subr.bf16.mxu0 %v4299_v0  ;;  %3774 = vmatpush3.bf16.msra.mxu1 %v4301_v2 }
 0x882   :  { %4065 = vmatprep.subr.bf16.mxu1 %v4303_v4 }
 0x884   :  { %4058 = vmatpush3.bf16.msra.mxu0 %v4299_v0 }
 0x885   :  { %4059 = vmatprep.subr.bf16.mxu0 %v4302_v3 }
 0x888   :  { %4060 = vmatpush3.bf16.msra.mxu0 %v4302_v3 }
 0x889   :  { %4085 = vmatprep.subr.bf16.mxu0 %v4311_v25 }
 0x924   :  { %v3737_v5 = vpop.f32.mrf.mxu1 }
 0x926   :  { %v3738_v6 = vpop.f32.mrf.mxu1 }
 0x927   :  { %v3739_v8 = vadd.f32 %v3738_v6, %v3737_v5  ;;  %v4305_v6 = vld [vmem:[#allocation2 + $0x628] sm:$0xff]  }
 0x928   :  { %v3740_v14 = vpop.f32.mrf.mxu1 }
 0x929   :  { %v2401_v21 = vadd.f32 %v3739_v8, %v2221_v15  ;;  %v4306_v8 = vld [vmem:[#allocation2 + $0x620] sm:$0xff]  }
 0x92a   :  { %v3741_v17 = vpop.f32.mrf.mxu1 }
 0x92b   :  { %v4043_v19 = vpop.f32.mrf.mxu0  ;;  %v3742_v10 = vadd.f32 %v3741_v17, %v3740_v14  ;;  %v4309_v14 = vld [vmem:[#allocation2 + $0x608] sm:$0xff]   ;;  %v4312_v17 = vld [vmem:[#allocation2 + $0x670] sm:$0xff]  }
 0x92c   :  { %v3743_v20 = vpop.f32.mrf.mxu1 }
 0x92d   :  { %v2449_v22 = vpop.f32.mrf.mxu0  ;;  %v2404_v29 = vadd.f32 %v3742_v10, %v2221_v15  ;;  %v4314_v10 = vld [vmem:[#allocation2 + $0x660] sm:$0xff]  }
 0x92e   :  { %v2450_v23 = vadd.f32 %v2449_v22, %v2401_v21  ;;  %v3744_v24 = vpop.f32.mrf.mxu1  ;;  %v2563_v22 = vrot.slane %v4563_v12, %v1014_v33 }
 0x92f   :  { %v3745_v26 = vadd.f32 %v3744_v24, %v3743_v20  ;;  %v4044_v7 = vpop.f32.mrf.mxu0  ;;  %v4315_v20 = vld [vmem:[#allocation2 + $0x658] sm:$0xff]  }
 0x930   :  { %v2464_v27 = vmax.f32 %v2450_v23, 0.0  ;;  %v3746_v28 = vpop.f32.mrf.mxu1 }
 0x931   :  { %v2409_v30 = vadd.f32 %v3745_v26, %v2221_v15  ;;  %v2452_v31 = vpop.f32.mrf.mxu0 }
 0x932   :  { %v2472_v16 = vrot.slane %v2464_v27, 4  ;;  %v2453_v35 = vadd.f32 %v2452_v31, %v2404_v29  ;;  %v3747_v36 = vpop.f32.mrf.mxu1 }
 0x933   :  { %v2458_v37 = vadd.f32 %v4043_v19, %v2409_v30  ;;  %v3748_v51 = vadd.f32 %v3747_v36, %v3746_v28  ;;  %v4313_v19 = vld [vmem:[#allocation2 + $0x668] sm:$0xff]  }
 0x934   :  { %v2465_v38 = vmax.f32 %v2453_v35, 0.0  ;;  %v2484_v42 = vsel %vm333_vm5, 0.0, %v2472_v16 }
 0x935   :  { %v2466_v39 = vmax.f32 %v2458_v37, 0.0  ;;  %v2412_v41 = vadd.f32 %v3748_v51, %v2221_v15  ;;  %v2492_v48 = vrot.slane %v2484_v42, 4  ;;  %v4310_v15 = vld [vmem:[#allocation2 + $0x600] sm:$0xff]  }
 0x936   :  { %v2473_v43 = vrot.slane %v2465_v38, 4 }
 0x937   :  { %v2461_v44 = vadd.f32 %v4044_v7, %v2412_v41  ;;  %v2475_v45 = vrot.slane %v2466_v39, 4 }
 0x938   :  { %v2474_v46 = vsel %vm333_vm5, %v2472_v16, %v2473_v43  ;;  %v2486_v47 = vsel %vm333_vm5, %v2473_v43, 0.0 }
 0x939   :  { %v2493_v49 = vrot.slane %v2474_v46, 4  ;;  %v2495_v50 = vrot.slane %v2486_v47, 4  ;;  %v3509_v18 = vpack.c.bf16 %v2473_v43, %v2474_v46  ;;  %v2467_v52 = vmax.f32 %v2461_v44, 0.0 }
 0x93a   :  { %v2485_v9 = vsel %vm333_vm5, 0.0, %v2475_v45  ;;  %v3502_v32 = vpack.c.bf16 %v2474_v46, %v2472_v16 }
 0x93b   :  { %4061 = vmatprep.mubr.msk.bf16.mxu0 %vm4513_vm9, %v3509_v18  ;;  %v2494_v53 = vsel %vm333_vm5, %v2492_v48, %v2493_v49  ;;  %v2496_v54 = vsel %vm333_vm5, %v2493_v49, %v2495_v50  ;;  %v2476_v55 = vrot.slane %v2467_v52, 4  ;;  %v2497_v61 = vrot.slane %v2485_v9, 4  ;;  %v4320_v9 = vld [vmem:[#allocation2 + $0x6b0] sm:$0xff]  }
 0x93c   :  { %v2555_v40 = vpack.c.bf16 %v2496_v54, %v2494_v53  ;;  %v4316_v53 = vld [vmem:[#allocation2 + $0x650] sm:$0xff]   ;;  %v4317_v54 = vld [vmem:[#allocation2 + $0x648] sm:$0xff]  }
 0x93d   :  { %v2477_v58 = vsel %vm333_vm5, %v2475_v45, %v2476_v55  ;;  %v2487_v59 = vsel %vm333_vm5, %v2476_v55, 0.0 }
 0x93e   :  { %2740 = vmatprep.mubr.bf16.mxu1 %v2555_v40  ;;  %v3512_v60 = vpack.c.bf16 %v2476_v55, %v2477_v58  ;;  %v2498_v62 = vrot.slane %v2477_v58, 4  ;;  %v2500_v0 = vrot.slane %v2487_v59, 4  ;;  %v3506_v5 = vpack.c.bf16 %v2477_v58, %v2475_v45  ;;  %v4318_v55 = vld [vmem:[#allocation2 + $0x640] sm:$0xff]   ;;  %v4319_v40 = vld [vmem:[#allocation2 + $0x6b8] sm:$0xff]  }
 0x93f   :  { %3503 = vmatmul.mubr.msk.bf16.vlgmr.msra.gmra.mxu1 %vm4523_vm11, %v3502_v32  ;;  %v4321_v32 = vld [vmem:[#allocation2 + $0x6a8] sm:$0xff]   ;;  %v4323_v58 = vld [vmem:[#allocation2 + $0x698] sm:$0xff]   ;;  %v2831_v59 = vrot.slane %v4563_v12, %v1145_v63 }
 0x940   :  { %4066 = vmatpush3.bf16.msra.mxu1 %v4303_v4  ;;  %4062 = vmatmul.mubr.msk.bf16.vlgmr.msra.gmra.mxu0 %vm4513_vm9, %v3512_v60  ;;  %v2499_v1 = vsel %vm333_vm5, %v2497_v61, %v2498_v62  ;;  %v2501_v2 = vsel %vm333_vm5, %v2498_v62, %v2500_v0  ;;  %v4308_v4 = vld [vmem:[#allocation2 + $0x610] sm:$0xff]  }
 0x941   :  { %4067 = vmatprep.subr.bf16.mxu1 %v4304_v57  ;;  %v2558_v3 = vpack.c.bf16 %v2501_v2, %v2499_v1  ;;  %4086 = vmatpush3.bf16.msra.mxu0 %v4311_v25 }
 0x942   :  { %4087 = vmatprep.subr.bf16.mxu0 %v4312_v17 }
 0x943   :  { %2748 = vmatprep.mubr.bf16.mxu1 %v2558_v3 }
 0x944   :  { %4068 = vmatpush3.bf16.msra.mxu1 %v4304_v57  ;;  %v4322_v57 = vld [vmem:[#allocation2 + $0x6a0] sm:$0xff]  }
 0x945   :  { %4069 = vmatprep.subr.bf16.mxu1 %v4305_v6  ;;  %4088 = vmatpush3.bf16.msra.mxu0 %v4312_v17 }
 0x946   :  { %4089 = vmatprep.subr.bf16.mxu0 %v4313_v19 }
 0x947   :  { %3507 = vmatmul.mubr.msk.bf16.gmra.mxu1 %vm4523_vm11, %v3506_v5  ;;  %vm3223_vm11 = vcmask 253952  }
 0x948   :  { %4070 = vmatpush3.bf16.msra.mxu1 %v4305_v6 }
 0x949   :  { %4071 = vmatprep.subr.bf16.mxu1 %v4306_v8  ;;  %4090 = vmatpush3.bf16.msra.mxu0 %v4313_v19 }
 0x94a   :  { %4091 = vmatprep.subr.bf16.mxu0 %v4314_v10 }
 0x94c   :  { %4072 = vmatpush3.bf16.msra.mxu1 %v4306_v8 }
 0x94d   :  { %4073 = vmatprep.subr.bf16.mxu1 %v4307_v11  ;;  %4092 = vmatpush3.bf16.msra.mxu0 %v4314_v10  ;;  %v4324_v10 = vld [vmem:[#allocation2 + $0x690] sm:$0xff]  }
 0x94e   :  { %4093 = vmatprep.subr.bf16.mxu0 %v4315_v20 }
 0x950   :  { %4074 = vmatpush3.bf16.msra.mxu1 %v4307_v11 }
 0x951   :  { %4075 = vmatprep.subr.bf16.mxu1 %v4308_v4  ;;  %4094 = vmatpush3.bf16.msra.mxu0 %v4315_v20  ;;  %v4325_v20 = vld [vmem:[#allocation2 + $0x688] sm:$0xff]  }
 0x952   :  { %4095 = vmatprep.subr.bf16.mxu0 %v4316_v53 }
 0x954   :  { %4076 = vmatpush3.bf16.msra.mxu1 %v4308_v4 }
 0x955   :  { %4077 = vmatprep.subr.bf16.mxu1 %v4309_v14  ;;  %4096 = vmatpush3.bf16.msra.mxu0 %v4316_v53 }
 0x956   :  { %4097 = vmatprep.subr.bf16.mxu0 %v4317_v54 }
 0x958   :  { %4078 = vmatpush3.bf16.msra.mxu1 %v4309_v14 }
 0x959   :  { %4079 = vmatprep.subr.bf16.mxu1 %v4310_v15  ;;  %4098 = vmatpush3.bf16.msra.mxu0 %v4317_v54 }
 0x95a   :  { %4099 = vmatprep.subr.bf16.mxu0 %v4318_v55 }
 0x95c   :  { %4080 = vmatpush3.bf16.msra.mxu1 %v4310_v15 }
 0x95d   :  { %4100 = vmatpush3.bf16.msra.mxu0 %v4318_v55  ;;  %4105 = vmatprep.subr.bf16.mxu1 %v4319_v40 }
 0x9ff   :  { %v3775_v21 = vpop.f32.mrf.mxu1 }
 0xa00   :  { %v4063_v23 = vpop.f32.mrf.mxu0 }
 0xa01   :  { %v3776_v24 = vpop.f32.mrf.mxu1 }
 0xa02   :  { %v3777_v26 = vadd.f32 %v3776_v24, %v3775_v21  ;;  %v2791_v7 = vpop.f32.mrf.mxu0  ;;  %v4326_v21 = vld [vmem:[#allocation2 + $0x680] sm:$0xff]  }
 0xa03   :  { %v3778_v27 = vpop.f32.mrf.mxu1 }
 0xa04   :  { %v2743_v28 = vadd.f32 %v3777_v26, %v2563_v22  ;;  %v4064_v29 = vpop.f32.mrf.mxu0 }
 0xa05   :  { %v3779_v30 = vpop.f32.mrf.mxu1 }
 0xa06   :  { %v3780_v31 = vadd.f32 %v3779_v30, %v3778_v27  ;;  %v2792_v35 = vadd.f32 %v2791_v7, %v2743_v28  ;;  %v2794_v37 = vpop.f32.mrf.mxu0 }
 0xa07   :  { %v3781_v16 = vpop.f32.mrf.mxu1 }
 0xa08   :  { %v2746_v36 = vadd.f32 %v3780_v31, %v2563_v22  ;;  %v2806_v42 = vmax.f32 %v2792_v35, 0.0 }
 0xa09   :  { %v3782_v51 = vpop.f32.mrf.mxu1 }
 0xa0a   :  { %v2795_v38 = vadd.f32 %v2794_v37, %v2746_v36  ;;  %v3783_v39 = vadd.f32 %v3782_v51, %v3781_v16 }
 0xa0b   :  { %v3784_v41 = vpop.f32.mrf.mxu1 }
 0xa0c   :  { %v2807_v43 = vmax.f32 %v2795_v38, 0.0  ;;  %v2751_v33 = vadd.f32 %v3783_v39, %v2563_v22 }
 0xa0d   :  { %v3785_v44 = vpop.f32.mrf.mxu1 }
 0xa0e   :  { %v2826_v45 = vpack.c.bf16 %v2807_v43, %v2806_v42  ;;  %v3786_v46 = vadd.f32 %v3785_v44, %v3784_v41  ;;  %v2800_v47 = vadd.f32 %v4063_v23, %v2751_v33  ;;  %v3207_v42 = vpop.trf.xlu0  ;;  %v3093_v33 = vrot.slane %v4563_v12, %v1395_v56 }
 0xa0f   :  { %3224 = vst.msk [vmem:[#allocation5] sm:$0x1] %vm3223_vm11, %v3207_v42 }
 0xa10   :  { %v2754_v48 = vadd.f32 %v3786_v46, %v2563_v22  ;;  %4081 = vmatprep.mubr.bf16.mxu1 %v2826_v45  ;;  %v2808_v50 = vmax.f32 %v2800_v47, 0.0  ;;  %v2962_v22 = vrot.slane %v4563_v12, %v1276_v34 }
 0xa12   :  { %v2803_v49 = vadd.f32 %v4064_v29, %v2754_v48 }
 0xa14   :  { %v2809_v18 = vmax.f32 %v2803_v49, 0.0 }
 0xa16   :  { %v2827_v52 = vpack.c.bf16 %v2809_v18, %v2808_v50 }
 0xa18   :  { %4082 = vmatmul.mubr.bf16.vlgmr.msra.gmra.mxu1 %v2827_v52 }
 0xa19   :  { %4106 = vmatpush3.bf16.msra.mxu1 %v4319_v40 }
 0xa1a   :  { %4107 = vmatprep.subr.bf16.mxu1 %v4320_v9 }
 0xa1d   :  { %4108 = vmatpush3.bf16.msra.mxu1 %v4320_v9 }
 0xa1e   :  { %4109 = vmatprep.subr.bf16.mxu1 %v4321_v32 }
 0xa21   :  { %4110 = vmatpush3.bf16.msra.mxu1 %v4321_v32 }
 0xa22   :  { %4111 = vmatprep.subr.bf16.mxu1 %v4322_v57 }
 0xa25   :  { %4112 = vmatpush3.bf16.msra.mxu1 %v4322_v57 }
 0xa26   :  { %4113 = vmatprep.subr.bf16.mxu1 %v4323_v58 }
 0xa29   :  { %4114 = vmatpush3.bf16.msra.mxu1 %v4323_v58 }
 0xa2a   :  { %4115 = vmatprep.subr.bf16.mxu1 %v4324_v10 }
 0xa2d   :  { %4116 = vmatpush3.bf16.msra.mxu1 %v4324_v10 }
 0xa2e   :  { %4117 = vmatprep.subr.bf16.mxu1 %v4325_v20 }
 0xa31   :  { %4118 = vmatpush3.bf16.msra.mxu1 %v4325_v20 }
 0xa32   :  { %4119 = vmatprep.subr.bf16.mxu1 %v4326_v21 }
 0xa35   :  { %4120 = vmatpush3.bf16.msra.mxu1 %v4326_v21 }
 0xad8   :  { %v4083_v60 = vpop.f32.mrf.mxu1 }
 0xad9   :  { %v2923_v0 = vadd.f32 %v4083_v60, %v2831_v59 }
 0xada   :  { %v2914_v61 = vpop.f32.mrf.mxu1 }
 0xadb   :  { %v2915_v62 = vadd.f32 %v2914_v61, %v2831_v59  ;;  %v2935_v11 = vmul.f32 0.01, %v2923_v0  ;;  %vm2931_vm3 = vcmp.gt.f32.partialorder %v2923_v0, 0.0 }
 0xadc   :  { %v4084_v1 = vpop.f32.mrf.mxu1 }
 0xadd   :  { %v2926_v2 = vadd.f32 %v4084_v1, %v2831_v59  ;;  %v2933_v5 = vmul.f32 0.01, %v2915_v62  ;;  %vm2929_vm1 = vcmp.gt.f32.partialorder %v2915_v62, 0.0  ;;  %v2939_v63 = vsel %vm2931_vm3, %v2923_v0, %v2935_v11 }
 0xade   :  { %v2917_v3 = vpop.f32.mrf.mxu1 }
 0xadf   :  { %vm2932_vm0 = vcmp.gt.f32.partialorder %v2926_v2, 0.0  ;;  %v2936_v6 = vmul.f32 0.01, %v2926_v2  ;;  %v2918_v8 = vadd.f32 %v2917_v3, %v2831_v59  ;;  %v2937_v15 = vsel %vm2929_vm1, %v2915_v62, %v2933_v5 }
 0xae1   :  { %vm2930_vm4 = vcmp.gt.f32.partialorder %v2918_v8, 0.0  ;;  %v2934_v4 = vmul.f32 0.01, %v2918_v8  ;;  %v2940_v14 = vsel %vm2932_vm0, %v2926_v2, %v2936_v6 }
 0xae2   :  { %v2958_v19 = vpack.c.bf16 %v2940_v14, %v2939_v63 }
 0xae3   :  { %v2938_v25 = vsel %vm2930_vm4, %v2918_v8, %v2934_v4 }
 0xae4   :  { %v2957_v17 = vpack.c.bf16 %v2938_v25, %v2937_v15 }
 0xae6   :  { %4101 = vmatprep.mubr.bf16.mxu0 %v2957_v17 }
 0xae7   :  { %4102 = vmatmul.mubr.bf16.vlgmr.msra.gmra.mxu0 %v2958_v19 }
 0xba7   :  { %v4103_v23 = vpop.f32.mrf.mxu0 }
 0xba8   :  { %v3054_v7 = vadd.f32 %v4103_v23, %v2962_v22 }
 0xba9   :  { %v3045_v24 = vpop.f32.mrf.mxu0 }
 0xbaa   :  { %v3046_v26 = vadd.f32 %v3045_v24, %v2962_v22  ;;  %v3066_v35 = vmul.f32 0.01, %v3054_v7  ;;  %vm3062_vm8 = vcmp.gt.f32.partialorder %v3054_v7, 0.0 }
 0xbab   :  { %v4104_v27 = vpop.f32.mrf.mxu0 }
 0xbac   :  { %v3057_v28 = vadd.f32 %v4104_v27, %v2962_v22  ;;  %v3064_v30 = vmul.f32 0.01, %v3046_v26  ;;  %vm3060_vm7 = vcmp.gt.f32.partialorder %v3046_v26, 0.0  ;;  %v3070_v34 = vsel %vm3062_vm8, %v3054_v7, %v3066_v35 }
 0xbad   :  { %v3048_v29 = vpop.f32.mrf.mxu0 }
 0xbae   :  { %vm3063_vm5 = vcmp.gt.f32.partialorder %v3057_v28, 0.0  ;;  %v3067_v31 = vmul.f32 0.01, %v3057_v28  ;;  %v3049_v16 = vadd.f32 %v3048_v29, %v2962_v22  ;;  %v3068_v51 = vsel %vm3060_vm7, %v3046_v26, %v3064_v30 }
 0xbb0   :  { %vm3061_vm9 = vcmp.gt.f32.partialorder %v3049_v16, 0.0  ;;  %v3065_v36 = vmul.f32 0.01, %v3049_v16  ;;  %v3071_v37 = vsel %vm3063_vm5, %v3057_v28, %v3067_v31 }
 0xbb1   :  { %v3089_v41 = vpack.c.bf16 %v3071_v37, %v3070_v34 }
 0xbb2   :  { %v3069_v38 = vsel %vm3061_vm9, %v3049_v16, %v3065_v36 }
 0xbb3   :  { %v3088_v39 = vpack.c.bf16 %v3069_v38, %v3068_v51 }
 0xbb5   :  { %4121 = vmatprep.mubr.bf16.mxu1 %v3088_v39 }
 0xbb6   :  { %4122 = vmatmul.mubr.bf16.vlgmr.msra.gmra.mxu1 %v3089_v41 }
 0xc76   :  { %v4123_v43 = vpop.f32.mrf.mxu1 }
 0xc78   :  { %v3176_v44 = vpop.f32.mrf.mxu1 }
 0xc79   :  { %v3177_v45 = vadd.f32 %v3176_v44, %v3093_v33 }
 0xc7a   :  { %v4124_v46 = vpop.f32.mrf.mxu1 }
 0xc7b   :  { %4358 = shalt.err (!%p4355_p9)
}
 0xc7c   :  { %3268 = dma.vmem_to_hbm [thread:$0]  %s3266_s6, 16, %s4659_s3, [#allocation4]   ;;  %3225 = vxpose.xlu1.b32.start [1/4] (short) (narrow) %v3177_v45, 8  ;;  %v3179_v13 = vpop.f32.mrf.mxu1  ;;  %v3185_v12 = vadd.f32 %v4123_v43, %v3093_v33  ;;  %v3188_v47 = vadd.f32 %v4124_v46, %v3093_v33  ;;  %vm3257_vm2 = vcmask 254976  }
 0xc7d   :  { %v3180_v56 = vadd.f32 %v3179_v13, %v3093_v33  ;;  %s4398_s11 = smov [#allocation6]  }
 0xc7e   :  { %s3275_s12 = sshll.u32 %s4398_s11, 4  ;;  %s3276_s12 = int_to_ptr.vmem [resolvable:$true] %s3275_s12 }
 0xc7f   :  { %s4367_s13 = scalar_lea.vmem %s3276_s12, 32  ;;  %p4372_p11 = scmp.lt.s32.totalorder %s3276_s12, %s3276_s12 }
 0xc80   :  { %3226 = vxpose.xlu1.b32.cont [2/4] (short) (narrow) %v3180_v56, 8  ;;  %p4368_p10 = scmp.ne.s32.totalorder %s3276_s12, %s4367_s13  ;;  %p4373_p12 = scmp.lt.s32.totalorder %s4367_s13, %s4367_s13 }
 0xc82   :  { %p4374_p13 = por %p4373_p12, %p4372_p11 }
 0xc84   :  { %3227 = vxpose.xlu1.b32.cont [3/4] (short) (narrow) %v3185_v12, 8  ;;  %p4375_p0 = pnand %p4374_p13, %p4368_p10 }
 0xc88   :  { %3228 = vxpose.xlu1.b32.end [4/4] (short) (narrow) %v3188_v47, 8 }
 0xcf8   :  { %v3241_v48 = vpop.trf.xlu1 }
 0xcf9   :  { %3258 = vst.msk [vmem:[#allocation6] sm:$0x3] %vm3257_vm2, %v3241_v48 }
 0xcfa   :  { %4378 = shalt.err (!%p4375_p0)
}
 0xcfb   :  { %3278 = dma.vmem_to_hbm [thread:$0]  %s3276_s12, 32, %s4660_s4, [#allocation7]  }
 0xcfc   :  { %4389 = dma.done.wait [#allocation4], 16  }
 0xcfd   :  { %4390 = vsyncadd [#allocation4], 4294967280 }
 0xcfe   :  { %4391 = dma.done.wait [#allocation7], 32  }
 0xcff   :  { %4392 = vsyncadd [#allocation7], 4294967264 }
 0xd00   :  { %3285 = vsyncpa [#allocation3], 1 }
 0xd01   :  { %3286 = vsyncpa [#allocation4], 1 }
 0xd02   :  { %3287 = vsyncpa [#allocation7], 1 }

</bundles_post_ra>
